<compile_context>
chip_gen: v7x
topology: tpu7x:2x2x1
jax: 0.10.0
libtpu: 0.0.40
codegen_flags: <defaults>
</compile_context>

<pallas_src>
import functools

import jax
import jax.numpy as jnp
from jax.experimental import pallas as pl
from jax.experimental.pallas import tpu as pltpu


def _round_up(a, m):
    return ((a + m - 1) // m) * m


def _ln_relu(y, gamma, beta, inv_c, eps):
    """LayerNorm over channels (one-pass stats, biased var) followed by ReLU.

    `y` is (rows, Cp) f32 with exact zeros in padded channel columns and
    gamma/beta zero-padded, so dividing the sums by the true channel count
    reproduces PyTorch's LayerNorm exactly (padded lanes stay 0).
    """
    ssum = jnp.sum(y, axis=-1, keepdims=True)
    ssq = jnp.sum(y * y, axis=-1, keepdims=True)
    mu = ssum * inv_c
    var = jnp.maximum(ssq * inv_c - mu * mu, 0.0)
    h = (y - mu) * jax.lax.rsqrt(var + eps) * gamma + beta
    return jnp.maximum(h, 0.0)


def _residual_block_kernel(scale_ref,                 # (1,) f32 in SMEM
                           x_cur_ref,                 # (1, TS, Cp)
                           x_halo_ref,                # (1, HALO, Cp)
                           w1_ref, b1_ref, g1_ref, bt1_ref,
                           w2_ref, b2_ref, g2_ref, bt2_ref,
                           o_ref,                     # (1, TS, Cp)
                           slab1, slab2,              # VMEM tap slabs
                           *, K, d1, d2, eps, inv_c,
                           TS, Cp, HALO, P1, P2, P2P):
    s = pl.program_id(1)
    R1 = TS + P2P                  # rows of hidden h this tile must produce
    base1 = HALO - P2P - P1        # first window row used by conv1, tap 0
    base2 = P2P - P2               # first h row used by conv2, tap 0

    # ---- conv1 tap slab, built directly from halo + current-tile refs --------
    # Window row w corresponds to global position s*TS - HALO + w.  Tap k reads
    # window rows [base1 + k*d1, base1 + k*d1 + R1); rows < HALO come from the
    # halo block, rows >= HALO from the current tile.
    for k in range(K):
        off = base1 + k * d1
        nh = HALO - off            # rows sourced from the halo block (>= 0)
        col = slice(k * Cp, (k + 1) * Cp)
        slab1[nh:R1, col] = x_cur_ref[0, 0:R1 - nh, :].astype(slab1.dtype)

    if P1 + P2P > 0:
        @pl.when(s != 0)
        def _():
            for k in range(K):
                off = base1 + k * d1
                nh = HALO - off
                if nh > 0:
                    slab1[0:nh, k * Cp:(k + 1) * Cp] = (
                        x_halo_ref[0, off:HALO, :].astype(slab1.dtype))

        @pl.when(s == 0)           # left of the sequence: causal zero padding
        def _():
            for k in range(K):
                nh = HALO - (base1 + k * d1)
                if nh > 0:
                    slab1[0:nh, k * Cp:(k + 1) * Cp] = jnp.zeros(
                        (nh, Cp), slab1.dtype)

    # ---- conv1: K dilated taps fused into ONE matmul (contraction K*Cp) ------
    y1 = jnp.dot(slab1[...], w1_ref[...], preferred_element_type=jnp.float32)
    y1 = y1 + b1_ref[...]
    h = _ln_relu(y1, g1_ref[...], bt1_ref[...], inv_c, eps)   # dropout1: p=0

    # ---- conv2 tap slab: scatter shifted h row-windows straight into slab2 ----
    for k in range(K):
        r0 = base2 + k * d2
        slab2[:, k * Cp:(k + 1) * Cp] = h[r0:r0 + TS, :].astype(slab2.dtype)

    if P2 > 0:
        @pl.when(s == 0)           # h positions < 0 feed conv2 as zeros
        def _():
            for k in range(K):
                nz = P2 - k * d2   # rows of this tap that lie before position 0
                if nz > 0:
                    slab2[0:nz, k * Cp:(k + 1) * Cp] = jnp.zeros(
                        (nz, Cp), slab2.dtype)

    # ---- conv2 (dilation * 2): same fused-tap scheme ---------------------------
    y2 = jnp.dot(slab2[...], w2_ref[...], preferred_element_type=jnp.float32)
    y2 = y2 + b2_ref[...]
    out2 = _ln_relu(y2, g2_ref[...], bt2_ref[...], inv_c, eps)  # dropout2: p=0

    # ---- residual (f32): a * out2 + x -----------------------------------------
    a = scale_ref[0]
    o_ref[0] = (a * out2 + x_cur_ref[0].astype(jnp.float32)).astype(o_ref.dtype)


def residual_block_b(x, params, *, kernel_size, dilation,
                     enable_res_parameter=False, eps=1e-8,
                     tile_seq=None, compute_dtype=jnp.bfloat16):
    """Forward pass of ResidualBlock_b.  x: [B, S, C] -> [B, S, C].

    Pass bf16 `x` to halve HBM I/O on bandwidth-limited chips (v5e/v6e); the
    residual add / LayerNorm stay in f32 inside the kernel regardless.
    """
    B, S, C = x.shape
    K = int(kernel_size)
    d1 = int(dilation)
    d2 = 2 * d1
    P1 = (K - 1) * d1                               # causal pad of conv1
    P2 = (K - 1) * d2                               # causal pad of conv2
    P2P = _round_up(P2, 8)                          # sublane-aligned h halo
    HALO = pl.next_power_of_2(max(P1 + P2P, 8))     # x halo (divides the tile)

    Cp = _round_up(C, 128)                          # lane-dense channels
    inv_c = 1.0 / float(C)
    in_item = jnp.dtype(x.dtype).itemsize
    c_item = jnp.dtype(compute_dtype).itemsize

    # sequence tile: power of two, >= HALO; auto-sized to amortize per-step
    # overhead and halo recompute, but capped by a v7x-safe VMEM budget.
    if tile_seq is None:
        tile_seq = max(1024, 8 * (P1 + P2P))
    ts = pl.next_power_of_2(max(8, min(int(tile_seq), S)))
    ts = max(ts, HALO)

    def vmem_estimate(t):
        tile_io = 2 * (t + HALO + t) * Cp * in_item       # x / halo / out, double-buffered
        slabs = ((t + P2P) + t) * K * Cp * c_item         # conv1 + conv2 tap slabs
        weights = 2 * 2 * (K * Cp) * Cp * c_item          # conservatively double-buffered
        vecs = 16 * Cp * 4
        return tile_io + slabs + weights + vecs

    VMEM_BUDGET = 40 * 1024 * 1024                        # v7x has 64 MiB physical VMEM
    while vmem_estimate(ts) > VMEM_BUDGET and ts // 2 >= max(HALO, 8):
        ts //= 2

    Sp = _round_up(S, ts)
    n_s = Sp // ts
    ratio = ts // HALO                                    # halo blocks per seq tile
    R1 = ts + P2P

    # ---- pad / reshape operands (zero padding keeps conv + LN exact) ----------
    x_p = jnp.pad(x, ((0, 0), (0, Sp - S), (0, Cp - C)))

    def prep_w(w):                                        # (K, Cin, Cout) -> (K*Cp, Cp)
        w = jnp.pad(jnp.asarray(w, jnp.float32), ((0, 0), (0, Cp - C), (0, Cp - C)))
        return w.reshape(K * Cp, Cp).astype(compute_dtype)

    def prep_v(v):                                        # (1, C) -> (1, Cp) f32
        return jnp.pad(jnp.asarray(v, jnp.float32).reshape(1, C),
                       ((0, 0), (0, Cp - C)))

    w1 = prep_w(params["w1"]); w2 = prep_w(params["w2"])
    b1 = prep_v(params["b1"]); b2 = prep_v(params["b2"])
    g1 = prep_v(params["g1"]); g2 = prep_v(params["g2"])
    bt1 = prep_v(params["bt1"]); bt2 = prep_v(params["bt2"])

    if enable_res_parameter:
        scale = jnp.asarray(params["a"], jnp.float32).reshape(1)
    else:
        scale = jnp.ones((1,), jnp.float32)

    kern = functools.partial(
        _residual_block_kernel,
        K=K, d1=d1, d2=d2, eps=float(eps), inv_c=inv_c,
        TS=ts, Cp=Cp, HALO=HALO, P1=P1, P2=P2, P2P=P2P)

    cost = pl.CostEstimate(
        flops=int(2 * K * Cp * Cp * (R1 + ts) * B * n_s),
        transcendentals=int((R1 + ts) * B * n_s),
        bytes_accessed=int((2 * B * Sp * Cp + B * n_s * HALO * Cp) * in_item
                           + 2 * K * Cp * Cp * c_item + 8 * Cp * 4))

    vmem_limit = int(min(48 * 1024 * 1024,
                         max(32 * 1024 * 1024, vmem_estimate(ts) + (8 << 20))))

    smem_spec = pl.BlockSpec(memory_space=pltpu.MemorySpace.SMEM)
    x_cur_spec = pl.BlockSpec((1, ts, Cp), lambda b, s: (b, s, 0))
    x_halo_spec = pl.BlockSpec(
        (1, HALO, Cp), lambda b, s: (b, jnp.maximum(s * ratio - 1, 0), 0))
    out_spec = pl.BlockSpec((1, ts, Cp), lambda b, s: (b, s, 0))

    def build(single_buffer_params):
        pm = dict(pipeline_mode=pl.Buffered(1)) if single_buffer_params else {}
        w_spec = pl.BlockSpec((K * Cp, Cp), lambda b, s: (0, 0), **pm)
        v_spec = pl.BlockSpec((1, Cp), lambda b, s: (0, 0), **pm)
        return pl.pallas_call(
            kern,
            out_shape=jax.ShapeDtypeStruct((B, Sp, Cp), x.dtype),
            grid_spec=pltpu.PrefetchScalarGridSpec(
                num_scalar_prefetch=0,
                grid=(B, n_s),
                in_specs=[
                    smem_spec,                               # residual scale a
                    x_cur_spec, x_halo_spec,                 # x tile + causal halo
                    w_spec, v_spec, v_spec, v_spec,          # conv1 / ln1 params
                    w_spec, v_spec, v_spec, v_spec,          # conv2 / ln2 params
                ],
                out_specs=out_spec,
                scratch_shapes=[
                    pltpu.VMEM((R1, K * Cp), compute_dtype),  # conv1 tap slab
                    pltpu.VMEM((ts, K * Cp), compute_dtype),  # conv2 tap slab
                ],
            ),
            compiler_params=pltpu.CompilerParams(
                dimension_semantics=("parallel", "parallel"),
                vmem_limit_bytes=vmem_limit),
            cost_estimate=cost,
        )

    args = (scale, x_p, x_p, w1, b1, g1, bt1, w2, b2, g2, bt2)
    try:
        # grid-invariant params single-buffered (halves their VMEM footprint on v7x)
        out_p = build(True)(*args)
    except Exception:
        # pl.Buffered(1) not supported by this JAX/backend -> default buffering.
        out_p = build(False)(*args)

    return out_p[:, :S, :C]


# ----------------------------- pure-JAX reference ------------------------------
def _reference(x, params, *, kernel_size, dilation, enable_res_parameter=False,
               eps=1e-8, compute_dtype=jnp.float32):
    """Mirrors the PyTorch forward.  `compute_dtype` optionally rounds the
    matmul operands the way the kernel's bf16 path does."""
    K, d1 = kernel_size, dilation
    d2 = dilation * 2

    def causal_dilated_conv(h, w, b, d):
        S = h.shape[1]
        hp = jnp.pad(h.astype(compute_dtype), ((0, 0), ((K - 1) * d, 0), (0, 0)))
        wc = w.astype(compute_dtype)
        acc = jnp.zeros(h.shape[:2] + (w.shape[-1],), jnp.float32)
        for k in range(K):
            acc = acc + jnp.einsum("bsc,cd->bsd", hp[:, k * d:k * d + S, :],
                                   wc[k], preferred_element_type=jnp.float32)
        return acc + jnp.asarray(b, jnp.float32)

    def ln_relu(y, g, bt):
        mu = y.mean(-1, keepdims=True)
        var = ((y - mu) ** 2).mean(-1, keepdims=True)
        return jnp.maximum((y - mu) / jnp.sqrt(var + eps) * g + bt, 0.0)

    h = ln_relu(causal_dilated_conv(x, params["w1"], params["b1"], d1),
                params["g1"], params["bt1"])
    out2 = ln_relu(causal_dilated_conv(h, params["w2"], params["b2"], d2),
                   params["g2"], params["bt2"])
    scale = jnp.asarray(params["a"], jnp.float32) if enable_res_parameter else 1.0
    return scale * out2 + x


def _make_params(key, C, K):
    k1, k2, kb1, kb2, kg1, kg2, kt1, kt2 = jax.random.split(key, 8)
    return {
        # conv weights as [K, C_in, C_out]  (torch weight[o, i, 0, k] transposed)
        "w1": 0.1 * jax.random.normal(k1, (K, C, C), jnp.float32),
        "b1": 0.05 * jax.random.normal(kb1, (1, C), jnp.float32),
        "g1": 1.0 + 0.1 * jax.random.normal(kg1, (1, C), jnp.float32),
        "bt1": 0.1 * jax.random.normal(kt1, (1, C), jnp.float32),
        "w2": 0.1 * jax.random.normal(k2, (K, C, C), jnp.float32),
        "b2": 0.05 * jax.random.normal(kb2, (1, C), jnp.float32),
        "g2": 1.0 + 0.1 * jax.random.normal(kg2, (1, C), jnp.float32),
        "bt2": 0.1 * jax.random.normal(kt2, (1, C), jnp.float32),
        "a": jnp.float32(0.5),
    }


if __name__ == "__main__":
    key = jax.random.PRNGKey(0)

    # --- config 1: single sequence tile, C < 128 (channel-padding path) -------
    B, S, C, K, dil = 2, 16, 32, 3, 1
    kx, kp, key = jax.random.split(key, 3)
    x = jax.random.normal(kx, (B, S, C), jnp.float32)
    params = _make_params(kp, C, K)

    out_f32 = jax.block_until_ready(
        residual_block_b(x, params, kernel_size=K, dilation=dil,
                         compute_dtype=jnp.float32))
    ref_f32 = _reference(x, params, kernel_size=K, dilation=dil)
    assert out_f32.shape == x.shape and out_f32.dtype == x.dtype
    assert jnp.max(jnp.abs(out_f32 - ref_f32)) < 5e-5

    out_bf16 = jax.block_until_ready(
        residual_block_b(x, params, kernel_size=K, dilation=dil,
                         compute_dtype=jnp.bfloat16))
    ref_bf16 = _reference(x, params, kernel_size=K, dilation=dil,
                          compute_dtype=jnp.bfloat16)
    assert jnp.max(jnp.abs(out_bf16 - ref_bf16)) < 5e-3

    # --- config 2: multiple sequence tiles (halo path) + learnable residual ---
    B, S, C, K, dil = 2, 80, 32, 5, 2
    kx, kp, key = jax.random.split(key, 3)
    x = jax.random.normal(kx, (B, S, C), jnp.float32)
    params = _make_params(kp, C, K)

    out = jax.block_until_ready(
        residual_block_b(x, params, kernel_size=K, dilation=dil,
                         enable_res_parameter=True, tile_seq=16,
                         compute_dtype=jnp.float32))
    ref = _reference(x, params, kernel_size=K, dilation=dil,
                     enable_res_parameter=True)
    assert out.shape == x.shape
    assert jnp.max(jnp.abs(out - ref)) < 5e-5

    # --- config 3: C == 128 (no channel padding), larger dilation, 2 tiles ----
    B, S, C, K, dil = 2, 48, 128, 3, 4
    kx, kp, key = jax.random.split(key, 3)
    x = jax.random.normal(kx, (B, S, C), jnp.float32)
    params = _make_params(kp, C, K)

    out = jax.block_until_ready(
        residual_block_b(x, params, kernel_size=K, dilation=dil,
                         tile_seq=32, compute_dtype=jnp.float32))
    ref = _reference(x, params, kernel_size=K, dilation=dil)
    assert out.shape == x.shape
    assert jnp.max(jnp.abs(out - ref)) < 5e-5

    print("KERNEL_OK")
</pallas_src>

<mosaic_0001>
module attributes {stable_mosaic.version = 11 : i64} {
  func.func @_residual_block_kernel(%arg0: i32, %arg1: i32, %arg2: memref<1xf32, #tpu.memory_space<smem>>, %arg3: memref<1x16x128xf32, #tpu.memory_space<vmem>>, %arg4: memref<1x16x128xf32, #tpu.memory_space<vmem>>, %arg5: memref<384x128xf32, #tpu.memory_space<vmem>>, %arg6: memref<1x128xf32, #tpu.memory_space<vmem>>, %arg7: memref<1x128xf32, #tpu.memory_space<vmem>>, %arg8: memref<1x128xf32, #tpu.memory_space<vmem>>, %arg9: memref<384x128xf32, #tpu.memory_space<vmem>>, %arg10: memref<1x128xf32, #tpu.memory_space<vmem>>, %arg11: memref<1x128xf32, #tpu.memory_space<vmem>>, %arg12: memref<1x128xf32, #tpu.memory_space<vmem>>, %arg13: memref<1x16x128xf32, #tpu.memory_space<vmem>>, %arg14: memref<24x384xf32, #tpu.memory_space<vmem>>, %arg15: memref<16x384xf32, #tpu.memory_space<vmem>>) attributes {dimension_semantics = [#tpu.dimension_semantics<parallel>, #tpu.dimension_semantics<parallel>], iteration_bounds = array<i64: 2, 1>, scalar_prefetch = 0 : i64, scratch_operands = 2 : i64, tpu.core_type = #tpu.core_type<tc>, window_params = [{transform_indices = @transform_0, window_bounds = array<i64: 1>}, {transform_indices = @transform_1, window_bounds = array<i64: 1, 16, 128>}, {transform_indices = @transform_2, window_bounds = array<i64: 1, 16, 128>}, {pipeline_mode = #tpu.pipeline_mode<synchronous>, transform_indices = @transform_3, window_bounds = array<i64: 384, 128>}, {pipeline_mode = #tpu.pipeline_mode<synchronous>, transform_indices = @transform_4, window_bounds = array<i64: 1, 128>}, {pipeline_mode = #tpu.pipeline_mode<synchronous>, transform_indices = @transform_5, window_bounds = array<i64: 1, 128>}, {pipeline_mode = #tpu.pipeline_mode<synchronous>, transform_indices = @transform_6, window_bounds = array<i64: 1, 128>}, {pipeline_mode = #tpu.pipeline_mode<synchronous>, transform_indices = @transform_7, window_bounds = array<i64: 384, 128>}, {pipeline_mode = #tpu.pipeline_mode<synchronous>, transform_indices = @transform_8, window_bounds = array<i64: 1, 128>}, {pipeline_mode = #tpu.pipeline_mode<synchronous>, transform_indices = @transform_9, window_bounds = array<i64: 1, 128>}, {pipeline_mode = #tpu.pipeline_mode<synchronous>, transform_indices = @transform_10, window_bounds = array<i64: 1, 128>}, {transform_indices = @transform_11, window_bounds = array<i64: 1, 16, 128>}]} {
    %c0 = arith.constant 0 : index
    %c0_0 = arith.constant 0 : index
    %c0_1 = arith.constant 0 : index
    %0 = vector.load %arg3[%c0, %c0_0, %c0_1] : memref<1x16x128xf32, #tpu.memory_space<vmem>>, vector<1x14x128xf32>
    %1 = vector.shape_cast %0 : vector<1x14x128xf32> to vector<14x128xf32>
    %c10 = arith.constant 10 : index
    %c0_2 = arith.constant 0 : index
    %2 = vector.load %arg14[%c10, %c0_2] : memref<24x384xf32, #tpu.memory_space<vmem>>, vector<14x128xf32>
    tpu.vector_store %arg14[%c10, %c0_2], %1 {strides = array<i32>} : memref<24x384xf32, #tpu.memory_space<vmem>>, vector<14x128xf32>,
    %c0_3 = arith.constant 0 : index
    %c0_4 = arith.constant 0 : index
    %c0_5 = arith.constant 0 : index
    %3 = vector.load %arg3[%c0_3, %c0_4, %c0_5] : memref<1x16x128xf32, #tpu.memory_space<vmem>>, vector<1x15x128xf32>
    %4 = vector.shape_cast %3 : vector<1x15x128xf32> to vector<15x128xf32>
    %c9 = arith.constant 9 : index
    %c128 = arith.constant 128 : index
    %5 = vector.load %arg14[%c9, %c128] : memref<24x384xf32, #tpu.memory_space<vmem>>, vector<15x128xf32>
    tpu.vector_store %arg14[%c9, %c128], %4 {strides = array<i32>} : memref<24x384xf32, #tpu.memory_space<vmem>>, vector<15x128xf32>,
    %c0_6 = arith.constant 0 : index
    %c0_7 = arith.constant 0 : index
    %c0_8 = arith.constant 0 : index
    %6 = vector.load %arg3[%c0_6, %c0_7, %c0_8] : memref<1x16x128xf32, #tpu.memory_space<vmem>>, vector<1x16x128xf32>
    %7 = vector.shape_cast %6 : vector<1x16x128xf32> to vector<16x128xf32>
    %c8 = arith.constant 8 : index
    %c256 = arith.constant 256 : index
    %8 = vector.load %arg14[%c8, %c256] : memref<24x384xf32, #tpu.memory_space<vmem>>, vector<16x128xf32>
    tpu.vector_store %arg14[%c8, %c256], %7 {strides = array<i32>} : memref<24x384xf32, #tpu.memory_space<vmem>>, vector<16x128xf32>,
    %c0_i32 = arith.constant 0 : i32
    %9 = arith.cmpi ne, %arg1, %c0_i32 : i32
    %10 = arith.extui %9 : i1 to i32
    %c0_i32_9 = arith.constant 0 : i32
    %11 = arith.cmpi ne, %10, %c0_i32_9 : i32
    scf.if %11 {
      %c0_62 = arith.constant 0 : index
      %c6 = arith.constant 6 : index
      %c0_63 = arith.constant 0 : index
      %101 = vector.load %arg4[%c0_62, %c6, %c0_63] : memref<1x16x128xf32, #tpu.memory_space<vmem>>, vector<1x10x128xf32>
      %102 = vector.shape_cast %101 : vector<1x10x128xf32> to vector<10x128xf32>
      %c0_64 = arith.constant 0 : index
      %c0_65 = arith.constant 0 : index
      %103 = vector.load %arg14[%c0_64, %c0_65] : memref<24x384xf32, #tpu.memory_space<vmem>>, vector<10x128xf32>
      tpu.vector_store %arg14[%c0_64, %c0_65], %102 {strides = array<i32>} : memref<24x384xf32, #tpu.memory_space<vmem>>, vector<10x128xf32>,
      %c0_66 = arith.constant 0 : index
      %c7 = arith.constant 7 : index
      %c0_67 = arith.constant 0 : index
      %104 = vector.load %arg4[%c0_66, %c7, %c0_67] : memref<1x16x128xf32, #tpu.memory_space<vmem>>, vector<1x9x128xf32>
      %105 = vector.shape_cast %104 : vector<1x9x128xf32> to vector<9x128xf32>
      %c0_68 = arith.constant 0 : index
      %c128_69 = arith.constant 128 : index
      %106 = vector.load %arg14[%c0_68, %c128_69] : memref<24x384xf32, #tpu.memory_space<vmem>>, vector<9x128xf32>
      tpu.vector_store %arg14[%c0_68, %c128_69], %105 {strides = array<i32>} : memref<24x384xf32, #tpu.memory_space<vmem>>, vector<9x128xf32>,
      %c0_70 = arith.constant 0 : index
      %c8_71 = arith.constant 8 : index
      %c0_72 = arith.constant 0 : index
      %107 = vector.load %arg4[%c0_70, %c8_71, %c0_72] : memref<1x16x128xf32, #tpu.memory_space<vmem>>, vector<1x8x128xf32>
      %108 = vector.shape_cast %107 : vector<1x8x128xf32> to vector<8x128xf32>
      %c0_73 = arith.constant 0 : index
      %c256_74 = arith.constant 256 : index
      %109 = vector.load %arg14[%c0_73, %c256_74] : memref<24x384xf32, #tpu.memory_space<vmem>>, vector<8x128xf32>
      tpu.vector_store %arg14[%c0_73, %c256_74], %108 {strides = array<i32>} : memref<24x384xf32, #tpu.memory_space<vmem>>, vector<8x128xf32>,
    } else {
    }
    %c0_i32_10 = arith.constant 0 : i32
    %12 = arith.cmpi eq, %arg1, %c0_i32_10 : i32
    %13 = arith.extui %12 : i1 to i32
    %c0_i32_11 = arith.constant 0 : i32
    %14 = arith.cmpi ne, %13, %c0_i32_11 : i32
    scf.if %14 {
      %cst_62 = arith.constant 0.000000e+00 : f32
      %101 = vector.broadcast %cst_62 : f32 to vector<10x128xf32>
      %c0_63 = arith.constant 0 : index
      %c0_64 = arith.constant 0 : index
      %102 = vector.load %arg14[%c0_63, %c0_64] : memref<24x384xf32, #tpu.memory_space<vmem>>, vector<10x128xf32>
      tpu.vector_store %arg14[%c0_63, %c0_64], %101 {strides = array<i32>} : memref<24x384xf32, #tpu.memory_space<vmem>>, vector<10x128xf32>,
      %cst_65 = arith.constant 0.000000e+00 : f32
      %103 = vector.broadcast %cst_65 : f32 to vector<9x128xf32>
      %c0_66 = arith.constant 0 : index
      %c128_67 = arith.constant 128 : index
      %104 = vector.load %arg14[%c0_66, %c128_67] : memref<24x384xf32, #tpu.memory_space<vmem>>, vector<9x128xf32>
      tpu.vector_store %arg14[%c0_66, %c128_67], %103 {strides = array<i32>} : memref<24x384xf32, #tpu.memory_space<vmem>>, vector<9x128xf32>,
      %cst_68 = arith.constant 0.000000e+00 : f32
      %105 = vector.broadcast %cst_68 : f32 to vector<8x128xf32>
      %c0_69 = arith.constant 0 : index
      %c256_70 = arith.constant 256 : index
      %106 = vector.load %arg14[%c0_69, %c256_70] : memref<24x384xf32, #tpu.memory_space<vmem>>, vector<8x128xf32>
      tpu.vector_store %arg14[%c0_69, %c256_70], %105 {strides = array<i32>} : memref<24x384xf32, #tpu.memory_space<vmem>>, vector<8x128xf32>,
    } else {
    }
    %c0_12 = arith.constant 0 : index
    %c0_13 = arith.constant 0 : index
    %15 = vector.load %arg14[%c0_12, %c0_13] : memref<24x384xf32, #tpu.memory_space<vmem>>, vector<24x384xf32>
    %c0_14 = arith.constant 0 : index
    %c0_15 = arith.constant 0 : index
    %16 = vector.load %arg5[%c0_14, %c0_15] : memref<384x128xf32, #tpu.memory_space<vmem>>, vector<384x128xf32>
    %cst = arith.constant dense<0.000000e+00> : vector<24x128xf32>
    %17 = tpu.matmul %15, %16, %cst {dimension_numbers = #tpu.dot_dimension_numbers<[1], [0], [0], [1], [0, 0, 1, 1], [], []>} : vector<24x384xf32>, vector<384x128xf32>, vector<24x128xf32> -> vector<24x128xf32>
    %c0_16 = arith.constant 0 : index
    %c0_17 = arith.constant 0 : index
    %18 = vector.load %arg6[%c0_16, %c0_17] : memref<1x128xf32, #tpu.memory_space<vmem>>, vector<1x128xf32>
    %19 = vector.broadcast %18 : vector<1x128xf32> to vector<24x128xf32>
    %20 = arith.addf %17, %19 : vector<24x128xf32>
    %c0_18 = arith.constant 0 : index
    %c0_19 = arith.constant 0 : index
    %21 = vector.load %arg7[%c0_18, %c0_19] : memref<1x128xf32, #tpu.memory_space<vmem>>, vector<1x128xf32>
    %c0_20 = arith.constant 0 : index
    %c0_21 = arith.constant 0 : index
    %22 = vector.load %arg8[%c0_20, %c0_21] : memref<1x128xf32, #tpu.memory_space<vmem>>, vector<1x128xf32>
    %cst_22 = arith.constant dense<0.000000e+00> : vector<24xf32>
    %23 = vector.multi_reduction <add>, %20, %cst_22 [1] : vector<24x128xf32> to vector<24xf32>
    %24 = vector.shape_cast %23 : vector<24xf32> to vector<24x1xf32>
    %25 = arith.mulf %20, %20 : vector<24x128xf32>
    %cst_23 = arith.constant dense<0.000000e+00> : vector<24xf32>
    %26 = vector.multi_reduction <add>, %25, %cst_23 [1] : vector<24x128xf32> to vector<24xf32>
    %27 = vector.shape_cast %26 : vector<24xf32> to vector<24x1xf32>
    %cst_24 = arith.constant 3.125000e-02 : f32
    %28 = vector.broadcast %cst_24 : f32 to vector<24x1xf32>
    %29 = arith.mulf %24, %28 : vector<24x1xf32>
    %cst_25 = arith.constant 3.125000e-02 : f32
    %30 = vector.broadcast %cst_25 : f32 to vector<24x1xf32>
    %31 = arith.mulf %27, %30 : vector<24x1xf32>
    %32 = arith.mulf %29, %29 : vector<24x1xf32>
    %33 = arith.subf %31, %32 : vector<24x1xf32>
    %cst_26 = arith.constant 0.000000e+00 : f32
    %34 = vector.broadcast %cst_26 : f32 to vector<24x1xf32>
    %35 = arith.maximumf %33, %34 : vector<24x1xf32>
    %36 = vector.broadcast %29 : vector<24x1xf32> to vector<24x128xf32>
    %37 = arith.subf %20, %36 : vector<24x128xf32>
    %cst_27 = arith.constant 9.99999993E-9 : f32
    %38 = vector.broadcast %cst_27 : f32 to vector<24x1xf32>
    %39 = arith.addf %35, %38 : vector<24x1xf32>
    %40 = math.rsqrt %39 : vector<24x1xf32>
    %41 = vector.broadcast %40 : vector<24x1xf32> to vector<24x128xf32>
    %42 = arith.mulf %37, %41 : vector<24x128xf32>
    %43 = vector.broadcast %21 : vector<1x128xf32> to vector<24x128xf32>
    %44 = arith.mulf %42, %43 : vector<24x128xf32>
    %45 = vector.broadcast %22 : vector<1x128xf32> to vector<24x128xf32>
    %46 = arith.addf %44, %45 : vector<24x128xf32>
    %cst_28 = arith.constant 0.000000e+00 : f32
    %47 = vector.broadcast %cst_28 : f32 to vector<24x128xf32>
    %48 = arith.maximumf %46, %47 : vector<24x128xf32>
    %49 = vector.extract_strided_slice %48 {offsets = [4, 0], sizes = [16, 128], strides = [1, 1]} : vector<24x128xf32> to vector<16x128xf32>
    %c0_29 = arith.constant 0 : index
    %c0_30 = arith.constant 0 : index
    %50 = vector.load %arg15[%c0_29, %c0_30] : memref<16x384xf32, #tpu.memory_space<vmem>>, vector<16x128xf32>
    tpu.vector_store %arg15[%c0_29, %c0_30], %49 {strides = array<i32>} : memref<16x384xf32, #tpu.memory_space<vmem>>, vector<16x128xf32>,
    %51 = vector.extract_strided_slice %48 {offsets = [6, 0], sizes = [16, 128], strides = [1, 1]} : vector<24x128xf32> to vector<16x128xf32>
    %c0_31 = arith.constant 0 : index
    %c128_32 = arith.constant 128 : index
    %52 = vector.load %arg15[%c0_31, %c128_32] : memref<16x384xf32, #tpu.memory_space<vmem>>, vector<16x128xf32>
    tpu.vector_store %arg15[%c0_31, %c128_32], %51 {strides = array<i32>} : memref<16x384xf32, #tpu.memory_space<vmem>>, vector<16x128xf32>,
    %53 = vector.extract_strided_slice %48 {offsets = [8, 0], sizes = [16, 128], strides = [1, 1]} : vector<24x128xf32> to vector<16x128xf32>
    %c0_33 = arith.constant 0 : index
    %c256_34 = arith.constant 256 : index
    %54 = vector.load %arg15[%c0_33, %c256_34] : memref<16x384xf32, #tpu.memory_space<vmem>>, vector<16x128xf32>
    tpu.vector_store %arg15[%c0_33, %c256_34], %53 {strides = array<i32>} : memref<16x384xf32, #tpu.memory_space<vmem>>, vector<16x128xf32>,
    %c0_i32_35 = arith.constant 0 : i32
    %55 = arith.cmpi eq, %arg1, %c0_i32_35 : i32
    %56 = arith.extui %55 : i1 to i32
    %c0_i32_36 = arith.constant 0 : i32
    %57 = arith.cmpi ne, %56, %c0_i32_36 : i32
    scf.if %57 {
      %cst_62 = arith.constant 0.000000e+00 : f32
      %101 = vector.broadcast %cst_62 : f32 to vector<4x128xf32>
      %c0_63 = arith.constant 0 : index
      %c0_64 = arith.constant 0 : index
      %102 = vector.load %arg15[%c0_63, %c0_64] : memref<16x384xf32, #tpu.memory_space<vmem>>, vector<4x128xf32>
      tpu.vector_store %arg15[%c0_63, %c0_64], %101 {strides = array<i32>} : memref<16x384xf32, #tpu.memory_space<vmem>>, vector<4x128xf32>,
      %cst_65 = arith.constant 0.000000e+00 : f32
      %103 = vector.broadcast %cst_65 : f32 to vector<2x128xf32>
      %c0_66 = arith.constant 0 : index
      %c128_67 = arith.constant 128 : index
      %104 = vector.load %arg15[%c0_66, %c128_67] : memref<16x384xf32, #tpu.memory_space<vmem>>, vector<2x128xf32>
      tpu.vector_store %arg15[%c0_66, %c128_67], %103 {strides = array<i32>} : memref<16x384xf32, #tpu.memory_space<vmem>>, vector<2x128xf32>,
    } else {
    }
    %c0_37 = arith.constant 0 : index
    %c0_38 = arith.constant 0 : index
    %58 = vector.load %arg15[%c0_37, %c0_38] : memref<16x384xf32, #tpu.memory_space<vmem>>, vector<16x384xf32>
    %c0_39 = arith.constant 0 : index
    %c0_40 = arith.constant 0 : index
    %59 = vector.load %arg9[%c0_39, %c0_40] : memref<384x128xf32, #tpu.memory_space<vmem>>, vector<384x128xf32>
    %cst_41 = arith.constant dense<0.000000e+00> : vector<16x128xf32>
    %60 = tpu.matmul %58, %59, %cst_41 {dimension_numbers = #tpu.dot_dimension_numbers<[1], [0], [0], [1], [0, 0, 1, 1], [], []>} : vector<16x384xf32>, vector<384x128xf32>, vector<16x128xf32> -> vector<16x128xf32>
    %c0_42 = arith.constant 0 : index
    %c0_43 = arith.constant 0 : index
    %61 = vector.load %arg10[%c0_42, %c0_43] : memref<1x128xf32, #tpu.memory_space<vmem>>, vector<1x128xf32>
    %62 = vector.broadcast %61 : vector<1x128xf32> to vector<16x128xf32>
    %63 = arith.addf %60, %62 : vector<16x128xf32>
    %c0_44 = arith.constant 0 : index
    %c0_45 = arith.constant 0 : index
    %64 = vector.load %arg11[%c0_44, %c0_45] : memref<1x128xf32, #tpu.memory_space<vmem>>, vector<1x128xf32>
    %c0_46 = arith.constant 0 : index
    %c0_47 = arith.constant 0 : index
    %65 = vector.load %arg12[%c0_46, %c0_47] : memref<1x128xf32, #tpu.memory_space<vmem>>, vector<1x128xf32>
    %cst_48 = arith.constant dense<0.000000e+00> : vector<16xf32>
    %66 = vector.multi_reduction <add>, %63, %cst_48 [1] : vector<16x128xf32> to vector<16xf32>
    %67 = vector.shape_cast %66 : vector<16xf32> to vector<16x1xf32>
    %68 = arith.mulf %63, %63 : vector<16x128xf32>
    %cst_49 = arith.constant dense<0.000000e+00> : vector<16xf32>
    %69 = vector.multi_reduction <add>, %68, %cst_49 [1] : vector<16x128xf32> to vector<16xf32>
    %70 = vector.shape_cast %69 : vector<16xf32> to vector<16x1xf32>
    %cst_50 = arith.constant 3.125000e-02 : f32
    %71 = vector.broadcast %cst_50 : f32 to vector<16x1xf32>
    %72 = arith.mulf %67, %71 : vector<16x1xf32>
    %cst_51 = arith.constant 3.125000e-02 : f32
    %73 = vector.broadcast %cst_51 : f32 to vector<16x1xf32>
    %74 = arith.mulf %70, %73 : vector<16x1xf32>
    %75 = arith.mulf %72, %72 : vector<16x1xf32>
    %76 = arith.subf %74, %75 : vector<16x1xf32>
    %cst_52 = arith.constant 0.000000e+00 : f32
    %77 = vector.broadcast %cst_52 : f32 to vector<16x1xf32>
    %78 = arith.maximumf %76, %77 : vector<16x1xf32>
    %79 = vector.broadcast %72 : vector<16x1xf32> to vector<16x128xf32>
    %80 = arith.subf %63, %79 : vector<16x128xf32>
    %cst_53 = arith.constant 9.99999993E-9 : f32
    %81 = vector.broadcast %cst_53 : f32 to vector<16x1xf32>
    %82 = arith.addf %78, %81 : vector<16x1xf32>
    %83 = math.rsqrt %82 : vector<16x1xf32>
    %84 = vector.broadcast %83 : vector<16x1xf32> to vector<16x128xf32>
    %85 = arith.mulf %80, %84 : vector<16x128xf32>
    %86 = vector.broadcast %64 : vector<1x128xf32> to vector<16x128xf32>
    %87 = arith.mulf %85, %86 : vector<16x128xf32>
    %88 = vector.broadcast %65 : vector<1x128xf32> to vector<16x128xf32>
    %89 = arith.addf %87, %88 : vector<16x128xf32>
    %cst_54 = arith.constant 0.000000e+00 : f32
    %90 = vector.broadcast %cst_54 : f32 to vector<16x128xf32>
    %91 = arith.maximumf %89, %90 : vector<16x128xf32>
    %c0_55 = arith.constant 0 : index
    %92 = memref.load %arg2[%c0_55] : memref<1xf32, #tpu.memory_space<smem>>
    %93 = vector.broadcast %92 : f32 to vector<16x128xf32>
    %94 = arith.mulf %93, %91 : vector<16x128xf32>
    %c0_56 = arith.constant 0 : index
    %c0_57 = arith.constant 0 : index
    %c0_58 = arith.constant 0 : index
    %95 = vector.load %arg3[%c0_56, %c0_57, %c0_58] : memref<1x16x128xf32, #tpu.memory_space<vmem>>, vector<1x16x128xf32>
    %96 = vector.shape_cast %95 : vector<1x16x128xf32> to vector<16x128xf32>
    %97 = arith.addf %94, %96 : vector<16x128xf32>
    %c0_59 = arith.constant 0 : index
    %c0_60 = arith.constant 0 : index
    %c0_61 = arith.constant 0 : index
    %98 = vector.load %arg13[%c0_59, %c0_60, %c0_61] : memref<1x16x128xf32, #tpu.memory_space<vmem>>, vector<1x16x128xf32>
    %99 = vector.shape_cast %98 : vector<1x16x128xf32> to vector<16x128xf32>
    %100 = vector.shape_cast %97 : vector<16x128xf32> to vector<1x16x128xf32>
    tpu.vector_store %arg13[%c0_59, %c0_60, %c0_61], %100 {strides = array<i32>} : memref<1x16x128xf32, #tpu.memory_space<vmem>>, vector<1x16x128xf32>,
    return
  }
  func.func @transform_0(%arg0: i32, %arg1: i32) -> i32 {
    %c0_i32 = arith.constant 0 : i32
    %c0_i32_0 = arith.constant 0 : i32
    return %c0_i32 : i32
  }
  func.func @transform_1(%arg0: i32, %arg1: i32) -> (i32, i32, i32) {
    %c0_i32 = arith.constant 0 : i32
    %c0_i32_0 = arith.constant 0 : i32
    return %arg0, %arg1, %c0_i32 : i32, i32, i32
  }
  func.func @transform_2(%arg0: i32, %arg1: i32) -> (i32, i32, i32) {
    %c1_i32 = arith.constant 1 : i32
    %0 = arith.muli %arg1, %c1_i32 : i32
    %c1_i32_0 = arith.constant 1 : i32
    %1 = arith.subi %0, %c1_i32_0 : i32
    %c0_i32 = arith.constant 0 : i32
    %2 = arith.maxsi %1, %c0_i32 : i32
    %c0_i32_1 = arith.constant 0 : i32
    %c0_i32_2 = arith.constant 0 : i32
    return %arg0, %2, %c0_i32_1 : i32, i32, i32
  }
  func.func @transform_3(%arg0: i32, %arg1: i32) -> (i32, i32) {
    %c0_i32 = arith.constant 0 : i32
    %c0_i32_0 = arith.constant 0 : i32
    %c0_i32_1 = arith.constant 0 : i32
    return %c0_i32, %c0_i32_0 : i32, i32
  }
  func.func @transform_4(%arg0: i32, %arg1: i32) -> (i32, i32) {
    %c0_i32 = arith.constant 0 : i32
    %c0_i32_0 = arith.constant 0 : i32
    %c0_i32_1 = arith.constant 0 : i32
    return %c0_i32, %c0_i32_0 : i32, i32
  }
  func.func @transform_5(%arg0: i32, %arg1: i32) -> (i32, i32) {
    %c0_i32 = arith.constant 0 : i32
    %c0_i32_0 = arith.constant 0 : i32
    %c0_i32_1 = arith.constant 0 : i32
    return %c0_i32, %c0_i32_0 : i32, i32
  }
  func.func @transform_6(%arg0: i32, %arg1: i32) -> (i32, i32) {
    %c0_i32 = arith.constant 0 : i32
    %c0_i32_0 = arith.constant 0 : i32
    %c0_i32_1 = arith.constant 0 : i32
    return %c0_i32, %c0_i32_0 : i32, i32
  }
  func.func @transform_7(%arg0: i32, %arg1: i32) -> (i32, i32) {
    %c0_i32 = arith.constant 0 : i32
    %c0_i32_0 = arith.constant 0 : i32
    %c0_i32_1 = arith.constant 0 : i32
    return %c0_i32, %c0_i32_0 : i32, i32
  }
  func.func @transform_8(%arg0: i32, %arg1: i32) -> (i32, i32) {
    %c0_i32 = arith.constant 0 : i32
    %c0_i32_0 = arith.constant 0 : i32
    %c0_i32_1 = arith.constant 0 : i32
    return %c0_i32, %c0_i32_0 : i32, i32
  }
  func.func @transform_9(%arg0: i32, %arg1: i32) -> (i32, i32) {
    %c0_i32 = arith.constant 0 : i32
    %c0_i32_0 = arith.constant 0 : i32
    %c0_i32_1 = arith.constant 0 : i32
    return %c0_i32, %c0_i32_0 : i32, i32
  }
  func.func @transform_10(%arg0: i32, %arg1: i32) -> (i32, i32) {
    %c0_i32 = arith.constant 0 : i32
    %c0_i32_0 = arith.constant 0 : i32
    %c0_i32_1 = arith.constant 0 : i32
    return %c0_i32, %c0_i32_0 : i32, i32
  }
  func.func @transform_11(%arg0: i32, %arg1: i32) -> (i32, i32, i32) {
    %c0_i32 = arith.constant 0 : i32
    %c0_i32_0 = arith.constant 0 : i32
    return %arg0, %arg1, %c0_i32 : i32, i32, i32
  }
}

module attributes {stable_mosaic.version = 11 : i64} {
  func.func @_residual_block_kernel(%arg0: i32, %arg1: i32, %arg2: memref<1xf32, #tpu.memory_space<smem>>, %arg3: memref<1x16x128xf32, #tpu.memory_space<vmem>>, %arg4: memref<1x16x128xf32, #tpu.memory_space<vmem>>, %arg5: memref<384x128xf32, #tpu.memory_space<vmem>>, %arg6: memref<1x128xf32, #tpu.memory_space<vmem>>, %arg7: memref<1x128xf32, #tpu.memory_space<vmem>>, %arg8: memref<1x128xf32, #tpu.memory_space<vmem>>, %arg9: memref<384x128xf32, #tpu.memory_space<vmem>>, %arg10: memref<1x128xf32, #tpu.memory_space<vmem>>, %arg11: memref<1x128xf32, #tpu.memory_space<vmem>>, %arg12: memref<1x128xf32, #tpu.memory_space<vmem>>, %arg13: memref<1x16x128xf32, #tpu.memory_space<vmem>>, %arg14: memref<24x384xf32, #tpu.memory_space<vmem>>, %arg15: memref<16x384xf32, #tpu.memory_space<vmem>>) attributes {dimension_semantics = [#tpu.dimension_semantics<parallel>, #tpu.dimension_semantics<parallel>], iteration_bounds = array<i64: 2, 1>, scalar_prefetch = 0 : i64, scratch_operands = 2 : i64, tpu.core_type = #tpu.core_type<tc>, window_params = [{transform_indices = @transform_0, window_bounds = array<i64: 1>}, {transform_indices = @transform_1, window_bounds = array<i64: 1, 16, 128>}, {transform_indices = @transform_2, window_bounds = array<i64: 1, 16, 128>}, {pipeline_mode = #tpu.pipeline_mode<synchronous>, transform_indices = @transform_3, window_bounds = array<i64: 384, 128>}, {pipeline_mode = #tpu.pipeline_mode<synchronous>, transform_indices = @transform_4, window_bounds = array<i64: 1, 128>}, {pipeline_mode = #tpu.pipeline_mode<synchronous>, transform_indices = @transform_5, window_bounds = array<i64: 1, 128>}, {pipeline_mode = #tpu.pipeline_mode<synchronous>, transform_indices = @transform_6, window_bounds = array<i64: 1, 128>}, {pipeline_mode = #tpu.pipeline_mode<synchronous>, transform_indices = @transform_7, window_bounds = array<i64: 384, 128>}, {pipeline_mode = #tpu.pipeline_mode<synchronous>, transform_indices = @transform_8, window_bounds = array<i64: 1, 128>}, {pipeline_mode = #tpu.pipeline_mode<synchronous>, transform_indices = @transform_9, window_bounds = array<i64: 1, 128>}, {pipeline_mode = #tpu.pipeline_mode<synchronous>, transform_indices = @transform_10, window_bounds = array<i64: 1, 128>}, {transform_indices = @transform_11, window_bounds = array<i64: 1, 16, 128>}]} {
    %c0 = arith.constant 0 : index
    %c0_0 = arith.constant 0 : index
    %c0_1 = arith.constant 0 : index
    %0 = vector.load %arg3[%c0, %c0_0, %c0_1] : memref<1x16x128xf32, #tpu.memory_space<vmem>>, vector<1x14x128xf32>
    %1 = vector.shape_cast %0 : vector<1x14x128xf32> to vector<14x128xf32>
    %c10 = arith.constant 10 : index
    %c0_2 = arith.constant 0 : index
    %2 = vector.load %arg14[%c10, %c0_2] : memref<24x384xf32, #tpu.memory_space<vmem>>, vector<14x128xf32>
    tpu.vector_store %arg14[%c10, %c0_2], %1 {strides = array<i32>} : memref<24x384xf32, #tpu.memory_space<vmem>>, vector<14x128xf32>,
    %c0_3 = arith.constant 0 : index
    %c0_4 = arith.constant 0 : index
    %c0_5 = arith.constant 0 : index
    %3 = vector.load %arg3[%c0_3, %c0_4, %c0_5] : memref<1x16x128xf32, #tpu.memory_space<vmem>>, vector<1x15x128xf32>
    %4 = vector.shape_cast %3 : vector<1x15x128xf32> to vector<15x128xf32>
    %c9 = arith.constant 9 : index
    %c128 = arith.constant 128 : index
    %5 = vector.load %arg14[%c9, %c128] : memref<24x384xf32, #tpu.memory_space<vmem>>, vector<15x128xf32>
    tpu.vector_store %arg14[%c9, %c128], %4 {strides = array<i32>} : memref<24x384xf32, #tpu.memory_space<vmem>>, vector<15x128xf32>,
    %c0_6 = arith.constant 0 : index
    %c0_7 = arith.constant 0 : index
    %c0_8 = arith.constant 0 : index
    %6 = vector.load %arg3[%c0_6, %c0_7, %c0_8] : memref<1x16x128xf32, #tpu.memory_space<vmem>>, vector<1x16x128xf32>
    %7 = vector.shape_cast %6 : vector<1x16x128xf32> to vector<16x128xf32>
    %c8 = arith.constant 8 : index
    %c256 = arith.constant 256 : index
    %8 = vector.load %arg14[%c8, %c256] : memref<24x384xf32, #tpu.memory_space<vmem>>, vector<16x128xf32>
    tpu.vector_store %arg14[%c8, %c256], %7 {strides = array<i32>} : memref<24x384xf32, #tpu.memory_space<vmem>>, vector<16x128xf32>,
    %c0_i32 = arith.constant 0 : i32
    %9 = arith.cmpi ne, %arg1, %c0_i32 : i32
    %10 = arith.extui %9 : i1 to i32
    %c0_i32_9 = arith.constant 0 : i32
    %11 = arith.cmpi ne, %10, %c0_i32_9 : i32
    scf.if %11 {
      %c0_62 = arith.constant 0 : index
      %c6 = arith.constant 6 : index
      %c0_63 = arith.constant 0 : index
      %101 = vector.load %arg4[%c0_62, %c6, %c0_63] : memref<1x16x128xf32, #tpu.memory_space<vmem>>, vector<1x10x128xf32>
      %102 = vector.shape_cast %101 : vector<1x10x128xf32> to vector<10x128xf32>
      %c0_64 = arith.constant 0 : index
      %c0_65 = arith.constant 0 : index
      %103 = vector.load %arg14[%c0_64, %c0_65] : memref<24x384xf32, #tpu.memory_space<vmem>>, vector<10x128xf32>
      tpu.vector_store %arg14[%c0_64, %c0_65], %102 {strides = array<i32>} : memref<24x384xf32, #tpu.memory_space<vmem>>, vector<10x128xf32>,
      %c0_66 = arith.constant 0 : index
      %c7 = arith.constant 7 : index
      %c0_67 = arith.constant 0 : index
      %104 = vector.load %arg4[%c0_66, %c7, %c0_67] : memref<1x16x128xf32, #tpu.memory_space<vmem>>, vector<1x9x128xf32>
      %105 = vector.shape_cast %104 : vector<1x9x128xf32> to vector<9x128xf32>
      %c0_68 = arith.constant 0 : index
      %c128_69 = arith.constant 128 : index
      %106 = vector.load %arg14[%c0_68, %c128_69] : memref<24x384xf32, #tpu.memory_space<vmem>>, vector<9x128xf32>
      tpu.vector_store %arg14[%c0_68, %c128_69], %105 {strides = array<i32>} : memref<24x384xf32, #tpu.memory_space<vmem>>, vector<9x128xf32>,
      %c0_70 = arith.constant 0 : index
      %c8_71 = arith.constant 8 : index
      %c0_72 = arith.constant 0 : index
      %107 = vector.load %arg4[%c0_70, %c8_71, %c0_72] : memref<1x16x128xf32, #tpu.memory_space<vmem>>, vector<1x8x128xf32>
      %108 = vector.shape_cast %107 : vector<1x8x128xf32> to vector<8x128xf32>
      %c0_73 = arith.constant 0 : index
      %c256_74 = arith.constant 256 : index
      %109 = vector.load %arg14[%c0_73, %c256_74] : memref<24x384xf32, #tpu.memory_space<vmem>>, vector<8x128xf32>
      tpu.vector_store %arg14[%c0_73, %c256_74], %108 {strides = array<i32>} : memref<24x384xf32, #tpu.memory_space<vmem>>, vector<8x128xf32>,
    } else {
    }
    %c0_i32_10 = arith.constant 0 : i32
    %12 = arith.cmpi eq, %arg1, %c0_i32_10 : i32
    %13 = arith.extui %12 : i1 to i32
    %c0_i32_11 = arith.constant 0 : i32
    %14 = arith.cmpi ne, %13, %c0_i32_11 : i32
    scf.if %14 {
      %cst_62 = arith.constant 0.000000e+00 : f32
      %101 = vector.broadcast %cst_62 : f32 to vector<10x128xf32>
      %c0_63 = arith.constant 0 : index
      %c0_64 = arith.constant 0 : index
      %102 = vector.load %arg14[%c0_63, %c0_64] : memref<24x384xf32, #tpu.memory_space<vmem>>, vector<10x128xf32>
      tpu.vector_store %arg14[%c0_63, %c0_64], %101 {strides = array<i32>} : memref<24x384xf32, #tpu.memory_space<vmem>>, vector<10x128xf32>,
      %cst_65 = arith.constant 0.000000e+00 : f32
      %103 = vector.broadcast %cst_65 : f32 to vector<9x128xf32>
      %c0_66 = arith.constant 0 : index
      %c128_67 = arith.constant 128 : index
      %104 = vector.load %arg14[%c0_66, %c128_67] : memref<24x384xf32, #tpu.memory_space<vmem>>, vector<9x128xf32>
      tpu.vector_store %arg14[%c0_66, %c128_67], %103 {strides = array<i32>} : memref<24x384xf32, #tpu.memory_space<vmem>>, vector<9x128xf32>,
      %cst_68 = arith.constant 0.000000e+00 : f32
      %105 = vector.broadcast %cst_68 : f32 to vector<8x128xf32>
      %c0_69 = arith.constant 0 : index
      %c256_70 = arith.constant 256 : index
      %106 = vector.load %arg14[%c0_69, %c256_70] : memref<24x384xf32, #tpu.memory_space<vmem>>, vector<8x128xf32>
      tpu.vector_store %arg14[%c0_69, %c256_70], %105 {strides = array<i32>} : memref<24x384xf32, #tpu.memory_space<vmem>>, vector<8x128xf32>,
    } else {
    }
    %c0_12 = arith.constant 0 : index
    %c0_13 = arith.constant 0 : index
    %15 = vector.load %arg14[%c0_12, %c0_13] : memref<24x384xf32, #tpu.memory_space<vmem>>, vector<24x384xf32>
    %c0_14 = arith.constant 0 : index
    %c0_15 = arith.constant 0 : index
    %16 = vector.load %arg5[%c0_14, %c0_15] : memref<384x128xf32, #tpu.memory_space<vmem>>, vector<384x128xf32>
    %cst = arith.constant dense<0.000000e+00> : vector<24x128xf32>
    %17 = tpu.matmul %15, %16, %cst {dimension_numbers = #tpu.dot_dimension_numbers<[1], [0], [0], [1], [0, 0, 1, 1], [], []>} : vector<24x384xf32>, vector<384x128xf32>, vector<24x128xf32> -> vector<24x128xf32>
    %c0_16 = arith.constant 0 : index
    %c0_17 = arith.constant 0 : index
    %18 = vector.load %arg6[%c0_16, %c0_17] : memref<1x128xf32, #tpu.memory_space<vmem>>, vector<1x128xf32>
    %19 = vector.broadcast %18 : vector<1x128xf32> to vector<24x128xf32>
    %20 = arith.addf %17, %19 : vector<24x128xf32>
    %c0_18 = arith.constant 0 : index
    %c0_19 = arith.constant 0 : index
    %21 = vector.load %arg7[%c0_18, %c0_19] : memref<1x128xf32, #tpu.memory_space<vmem>>, vector<1x128xf32>
    %c0_20 = arith.constant 0 : index
    %c0_21 = arith.constant 0 : index
    %22 = vector.load %arg8[%c0_20, %c0_21] : memref<1x128xf32, #tpu.memory_space<vmem>>, vector<1x128xf32>
    %cst_22 = arith.constant dense<0.000000e+00> : vector<24xf32>
    %23 = vector.multi_reduction <add>, %20, %cst_22 [1] : vector<24x128xf32> to vector<24xf32>
    %24 = vector.shape_cast %23 : vector<24xf32> to vector<24x1xf32>
    %25 = arith.mulf %20, %20 : vector<24x128xf32>
    %cst_23 = arith.constant dense<0.000000e+00> : vector<24xf32>
    %26 = vector.multi_reduction <add>, %25, %cst_23 [1] : vector<24x128xf32> to vector<24xf32>
    %27 = vector.shape_cast %26 : vector<24xf32> to vector<24x1xf32>
    %cst_24 = arith.constant 3.125000e-02 : f32
    %28 = vector.broadcast %cst_24 : f32 to vector<24x1xf32>
    %29 = arith.mulf %24, %28 : vector<24x1xf32>
    %cst_25 = arith.constant 3.125000e-02 : f32
    %30 = vector.broadcast %cst_25 : f32 to vector<24x1xf32>
    %31 = arith.mulf %27, %30 : vector<24x1xf32>
    %32 = arith.mulf %29, %29 : vector<24x1xf32>
    %33 = arith.subf %31, %32 : vector<24x1xf32>
    %cst_26 = arith.constant 0.000000e+00 : f32
    %34 = vector.broadcast %cst_26 : f32 to vector<24x1xf32>
    %35 = arith.maximumf %33, %34 : vector<24x1xf32>
    %36 = vector.broadcast %29 : vector<24x1xf32> to vector<24x128xf32>
    %37 = arith.subf %20, %36 : vector<24x128xf32>
    %cst_27 = arith.constant 9.99999993E-9 : f32
    %38 = vector.broadcast %cst_27 : f32 to vector<24x1xf32>
    %39 = arith.addf %35, %38 : vector<24x1xf32>
    %40 = math.rsqrt %39 : vector<24x1xf32>
    %41 = vector.broadcast %40 : vector<24x1xf32> to vector<24x128xf32>
    %42 = arith.mulf %37, %41 : vector<24x128xf32>
    %43 = vector.broadcast %21 : vector<1x128xf32> to vector<24x128xf32>
    %44 = arith.mulf %42, %43 : vector<24x128xf32>
    %45 = vector.broadcast %22 : vector<1x128xf32> to vector<24x128xf32>
    %46 = arith.addf %44, %45 : vector<24x128xf32>
    %cst_28 = arith.constant 0.000000e+00 : f32
    %47 = vector.broadcast %cst_28 : f32 to vector<24x128xf32>
    %48 = arith.maximumf %46, %47 : vector<24x128xf32>
    %49 = vector.extract_strided_slice %48 {offsets = [4, 0], sizes = [16, 128], strides = [1, 1]} : vector<24x128xf32> to vector<16x128xf32>
    %c0_29 = arith.constant 0 : index
    %c0_30 = arith.constant 0 : index
    %50 = vector.load %arg15[%c0_29, %c0_30] : memref<16x384xf32, #tpu.memory_space<vmem>>, vector<16x128xf32>
    tpu.vector_store %arg15[%c0_29, %c0_30], %49 {strides = array<i32>} : memref<16x384xf32, #tpu.memory_space<vmem>>, vector<16x128xf32>,
    %51 = vector.extract_strided_slice %48 {offsets = [6, 0], sizes = [16, 128], strides = [1, 1]} : vector<24x128xf32> to vector<16x128xf32>
    %c0_31 = arith.constant 0 : index
    %c128_32 = arith.constant 128 : index
    %52 = vector.load %arg15[%c0_31, %c128_32] : memref<16x384xf32, #tpu.memory_space<vmem>>, vector<16x128xf32>
    tpu.vector_store %arg15[%c0_31, %c128_32], %51 {strides = array<i32>} : memref<16x384xf32, #tpu.memory_space<vmem>>, vector<16x128xf32>,
    %53 = vector.extract_strided_slice %48 {offsets = [8, 0], sizes = [16, 128], strides = [1, 1]} : vector<24x128xf32> to vector<16x128xf32>
    %c0_33 = arith.constant 0 : index
    %c256_34 = arith.constant 256 : index
    %54 = vector.load %arg15[%c0_33, %c256_34] : memref<16x384xf32, #tpu.memory_space<vmem>>, vector<16x128xf32>
    tpu.vector_store %arg15[%c0_33, %c256_34], %53 {strides = array<i32>} : memref<16x384xf32, #tpu.memory_space<vmem>>, vector<16x128xf32>,
    %c0_i32_35 = arith.constant 0 : i32
    %55 = arith.cmpi eq, %arg1, %c0_i32_35 : i32
    %56 = arith.extui %55 : i1 to i32
    %c0_i32_36 = arith.constant 0 : i32
    %57 = arith.cmpi ne, %56, %c0_i32_36 : i32
    scf.if %57 {
      %cst_62 = arith.constant 0.000000e+00 : f32
      %101 = vector.broadcast %cst_62 : f32 to vector<4x128xf32>
      %c0_63 = arith.constant 0 : index
      %c0_64 = arith.constant 0 : index
      %102 = vector.load %arg15[%c0_63, %c0_64] : memref<16x384xf32, #tpu.memory_space<vmem>>, vector<4x128xf32>
      tpu.vector_store %arg15[%c0_63, %c0_64], %101 {strides = array<i32>} : memref<16x384xf32, #tpu.memory_space<vmem>>, vector<4x128xf32>,
      %cst_65 = arith.constant 0.000000e+00 : f32
      %103 = vector.broadcast %cst_65 : f32 to vector<2x128xf32>
      %c0_66 = arith.constant 0 : index
      %c128_67 = arith.constant 128 : index
      %104 = vector.load %arg15[%c0_66, %c128_67] : memref<16x384xf32, #tpu.memory_space<vmem>>, vector<2x128xf32>
      tpu.vector_store %arg15[%c0_66, %c128_67], %103 {strides = array<i32>} : memref<16x384xf32, #tpu.memory_space<vmem>>, vector<2x128xf32>,
    } else {
    }
    %c0_37 = arith.constant 0 : index
    %c0_38 = arith.constant 0 : index
    %58 = vector.load %arg15[%c0_37, %c0_38] : memref<16x384xf32, #tpu.memory_space<vmem>>, vector<16x384xf32>
    %c0_39 = arith.constant 0 : index
    %c0_40 = arith.constant 0 : index
    %59 = vector.load %arg9[%c0_39, %c0_40] : memref<384x128xf32, #tpu.memory_space<vmem>>, vector<384x128xf32>
    %cst_41 = arith.constant dense<0.000000e+00> : vector<16x128xf32>
    %60 = tpu.matmul %58, %59, %cst_41 {dimension_numbers = #tpu.dot_dimension_numbers<[1], [0], [0], [1], [0, 0, 1, 1], [], []>} : vector<16x384xf32>, vector<384x128xf32>, vector<16x128xf32> -> vector<16x128xf32>
    %c0_42 = arith.constant 0 : index
    %c0_43 = arith.constant 0 : index
    %61 = vector.load %arg10[%c0_42, %c0_43] : memref<1x128xf32, #tpu.memory_space<vmem>>, vector<1x128xf32>
    %62 = vector.broadcast %61 : vector<1x128xf32> to vector<16x128xf32>
    %63 = arith.addf %60, %62 : vector<16x128xf32>
    %c0_44 = arith.constant 0 : index
    %c0_45 = arith.constant 0 : index
    %64 = vector.load %arg11[%c0_44, %c0_45] : memref<1x128xf32, #tpu.memory_space<vmem>>, vector<1x128xf32>
    %c0_46 = arith.constant 0 : index
    %c0_47 = arith.constant 0 : index
    %65 = vector.load %arg12[%c0_46, %c0_47] : memref<1x128xf32, #tpu.memory_space<vmem>>, vector<1x128xf32>
    %cst_48 = arith.constant dense<0.000000e+00> : vector<16xf32>
    %66 = vector.multi_reduction <add>, %63, %cst_48 [1] : vector<16x128xf32> to vector<16xf32>
    %67 = vector.shape_cast %66 : vector<16xf32> to vector<16x1xf32>
    %68 = arith.mulf %63, %63 : vector<16x128xf32>
    %cst_49 = arith.constant dense<0.000000e+00> : vector<16xf32>
    %69 = vector.multi_reduction <add>, %68, %cst_49 [1] : vector<16x128xf32> to vector<16xf32>
    %70 = vector.shape_cast %69 : vector<16xf32> to vector<16x1xf32>
    %cst_50 = arith.constant 3.125000e-02 : f32
    %71 = vector.broadcast %cst_50 : f32 to vector<16x1xf32>
    %72 = arith.mulf %67, %71 : vector<16x1xf32>
    %cst_51 = arith.constant 3.125000e-02 : f32
    %73 = vector.broadcast %cst_51 : f32 to vector<16x1xf32>
    %74 = arith.mulf %70, %73 : vector<16x1xf32>
    %75 = arith.mulf %72, %72 : vector<16x1xf32>
    %76 = arith.subf %74, %75 : vector<16x1xf32>
    %cst_52 = arith.constant 0.000000e+00 : f32
    %77 = vector.broadcast %cst_52 : f32 to vector<16x1xf32>
    %78 = arith.maximumf %76, %77 : vector<16x1xf32>
    %79 = vector.broadcast %72 : vector<16x1xf32> to vector<16x128xf32>
    %80 = arith.subf %63, %79 : vector<16x128xf32>
    %cst_53 = arith.constant 9.99999993E-9 : f32
    %81 = vector.broadcast %cst_53 : f32 to vector<16x1xf32>
    %82 = arith.addf %78, %81 : vector<16x1xf32>
    %83 = math.rsqrt %82 : vector<16x1xf32>
    %84 = vector.broadcast %83 : vector<16x1xf32> to vector<16x128xf32>
    %85 = arith.mulf %80, %84 : vector<16x128xf32>
    %86 = vector.broadcast %64 : vector<1x128xf32> to vector<16x128xf32>
    %87 = arith.mulf %85, %86 : vector<16x128xf32>
    %88 = vector.broadcast %65 : vector<1x128xf32> to vector<16x128xf32>
    %89 = arith.addf %87, %88 : vector<16x128xf32>
    %cst_54 = arith.constant 0.000000e+00 : f32
    %90 = vector.broadcast %cst_54 : f32 to vector<16x128xf32>
    %91 = arith.maximumf %89, %90 : vector<16x128xf32>
    %c0_55 = arith.constant 0 : index
    %92 = memref.load %arg2[%c0_55] : memref<1xf32, #tpu.memory_space<smem>>
    %93 = vector.broadcast %92 : f32 to vector<16x128xf32>
    %94 = arith.mulf %93, %91 : vector<16x128xf32>
    %c0_56 = arith.constant 0 : index
    %c0_57 = arith.constant 0 : index
    %c0_58 = arith.constant 0 : index
    %95 = vector.load %arg3[%c0_56, %c0_57, %c0_58] : memref<1x16x128xf32, #tpu.memory_space<vmem>>, vector<1x16x128xf32>
    %96 = vector.shape_cast %95 : vector<1x16x128xf32> to vector<16x128xf32>
    %97 = arith.addf %94, %96 : vector<16x128xf32>
    %c0_59 = arith.constant 0 : index
    %c0_60 = arith.constant 0 : index
    %c0_61 = arith.constant 0 : index
    %98 = vector.load %arg13[%c0_59, %c0_60, %c0_61] : memref<1x16x128xf32, #tpu.memory_space<vmem>>, vector<1x16x128xf32>
    %99 = vector.shape_cast %98 : vector<1x16x128xf32> to vector<16x128xf32>
    %100 = vector.shape_cast %97 : vector<16x128xf32> to vector<1x16x128xf32>
    tpu.vector_store %arg13[%c0_59, %c0_60, %c0_61], %100 {strides = array<i32>} : memref<1x16x128xf32, #tpu.memory_space<vmem>>, vector<1x16x128xf32>,
    return
  }
  func.func @transform_0(%arg0: i32, %arg1: i32) -> i32 {
    %c0_i32 = arith.constant 0 : i32
    %c0_i32_0 = arith.constant 0 : i32
    return %c0_i32 : i32
  }
  func.func @transform_1(%arg0: i32, %arg1: i32) -> (i32, i32, i32) {
    %c0_i32 = arith.constant 0 : i32
    %c0_i32_0 = arith.constant 0 : i32
    return %arg0, %arg1, %c0_i32 : i32, i32, i32
  }
  func.func @transform_2(%arg0: i32, %arg1: i32) -> (i32, i32, i32) {
    %c1_i32 = arith.constant 1 : i32
    %0 = arith.muli %arg1, %c1_i32 : i32
    %c1_i32_0 = arith.constant 1 : i32
    %1 = arith.subi %0, %c1_i32_0 : i32
    %c0_i32 = arith.constant 0 : i32
    %2 = arith.maxsi %1, %c0_i32 : i32
    %c0_i32_1 = arith.constant 0 : i32
    %c0_i32_2 = arith.constant 0 : i32
    return %arg0, %2, %c0_i32_1 : i32, i32, i32
  }
  func.func @transform_3(%arg0: i32, %arg1: i32) -> (i32, i32) {
    %c0_i32 = arith.constant 0 : i32
    %c0_i32_0 = arith.constant 0 : i32
    %c0_i32_1 = arith.constant 0 : i32
    return %c0_i32, %c0_i32_0 : i32, i32
  }
  func.func @transform_4(%arg0: i32, %arg1: i32) -> (i32, i32) {
    %c0_i32 = arith.constant 0 : i32
    %c0_i32_0 = arith.constant 0 : i32
    %c0_i32_1 = arith.constant 0 : i32
    return %c0_i32, %c0_i32_0 : i32, i32
  }
  func.func @transform_5(%arg0: i32, %arg1: i32) -> (i32, i32) {
    %c0_i32 = arith.constant 0 : i32
    %c0_i32_0 = arith.constant 0 : i32
    %c0_i32_1 = arith.constant 0 : i32
    return %c0_i32, %c0_i32_0 : i32, i32
  }
  func.func @transform_6(%arg0: i32, %arg1: i32) -> (i32, i32) {
    %c0_i32 = arith.constant 0 : i32
    %c0_i32_0 = arith.constant 0 : i32
    %c0_i32_1 = arith.constant 0 : i32
    return %c0_i32, %c0_i32_0 : i32, i32
  }
  func.func @transform_7(%arg0: i32, %arg1: i32) -> (i32, i32) {
    %c0_i32 = arith.constant 0 : i32
    %c0_i32_0 = arith.constant 0 : i32
    %c0_i32_1 = arith.constant 0 : i32
    return %c0_i32, %c0_i32_0 : i32, i32
  }
  func.func @transform_8(%arg0: i32, %arg1: i32) -> (i32, i32) {
    %c0_i32 = arith.constant 0 : i32
    %c0_i32_0 = arith.constant 0 : i32
    %c0_i32_1 = arith.constant 0 : i32
    return %c0_i32, %c0_i32_0 : i32, i32
  }
  func.func @transform_9(%arg0: i32, %arg1: i32) -> (i32, i32) {
    %c0_i32 = arith.constant 0 : i32
    %c0_i32_0 = arith.constant 0 : i32
    %c0_i32_1 = arith.constant 0 : i32
    return %c0_i32, %c0_i32_0 : i32, i32
  }
  func.func @transform_10(%arg0: i32, %arg1: i32) -> (i32, i32) {
    %c0_i32 = arith.constant 0 : i32
    %c0_i32_0 = arith.constant 0 : i32
    %c0_i32_1 = arith.constant 0 : i32
    return %c0_i32, %c0_i32_0 : i32, i32
  }
  func.func @transform_11(%arg0: i32, %arg1: i32) -> (i32, i32, i32) {
    %c0_i32 = arith.constant 0 : i32
    %c0_i32_0 = arith.constant 0 : i32
    return %arg0, %arg1, %c0_i32 : i32, i32, i32
  }
}

</mosaic_0001>

<bundles_post_ra>
// kernel: tpu_custom_call.1
= control target key start
LH: loop header
LB: loop body
LE: loop exit
PB: predicated region body
PF: predicated region fallthrough
CT: control target
= control target key end

     0   :  { %s2427_s0 = inlined_call_operand.<no memory space> [shape: f32[1], index: 0, kind: input, shape index: {}]   ;;  %s2428_s1 = inlined_call_operand.hbm [shape: f32[2,16,128], index: 1, kind: input, shape index: {}]   ;;  %s2429_s2 = inlined_call_operand.hbm [shape: f32[2,16,128], index: 2, kind: input, shape index: {}]   ;;  %s2430_s3 = inlined_call_operand.hbm [shape: f32[384,128], index: 3, kind: input, shape index: {}]   ;;  %s2431_s4 = inlined_call_operand.vmem [shape: f32[1,128], index: 4, kind: input, shape index: {}]   ;;  %s2432_s5 = inlined_call_operand.vmem [shape: f32[1,128], index: 5, kind: input, shape index: {}]   ;;  %s2433_s6 = inlined_call_operand.vmem [shape: f32[1,128], index: 6, kind: input, shape index: {}]   ;;  %s2434_s7 = inlined_call_operand.hbm [shape: f32[384,128], index: 7, kind: input, shape index: {}]   ;;  %s2435_s8 = inlined_call_operand.vmem [shape: f32[1,128], index: 8, kind: input, shape index: {}]   ;;  %s2436_s9 = inlined_call_operand.vmem [shape: f32[1,128], index: 9, kind: input, shape index: {}]   ;;  %s2437_s10 = inlined_call_operand.vmem [shape: f32[1,128], index: 10, kind: input, shape index: {}]   ;;  %s2438_s11 = inlined_call_operand.hbm [shape: f32[2,16,128], index: 11, kind: output, shape index: {}]  }
   0x1   :  { %2452 = sst [smem:[#allocation25_spill]] %s2428_s1 }
   0x2   :  { %2453 = sst [smem:[#allocation26_spill]] %s2430_s3 }
   0x3   :  { %2454 = sst [smem:[#allocation27_spill]] %s2434_s7 }
   0x4   :  { %2455 = sst [smem:[#allocation28_spill]] %s2437_s10 }
   0x5   :  { %2456 = sst [smem:[#allocation29_spill]] %s2438_s11 }
   0x6   :  { %16 = sst [smem:[#allocation4]] %s2427_s0 }
   0x7   :  { %17 = vsyncpa [#allocation6], 0 }
   0x8   :  { %19 = vsyncpa [#allocation6 + $0x1], 0 }
   0x9   :  { %20 = vsyncpa [#allocation9], 0 }
   0xa   :  { %22 = vsyncpa [#allocation9 + $0x1], 0 }
   0xb   :  { %23 = vsyncpa [#allocation12], 0 }
   0xc   :  { %24 = vsyncpa [#allocation7], 0 }
   0xd   :  { %26 = vsyncpa [#allocation7 + $0x1], 0  ;;  %s2034_s19 = smov 0   ;;  %s2036_s20 = smov 0  }
   0xe   :  { %s2038_s21 = smov 0   ;;  %s2040_s22 = smov 0  }
   0xf   :  { %s2042_s23 = smov 0   ;;  %s2044_s24 = smov 0  }
  0x10 LB: > { %2457 = sst [smem:[#allocation19_spill]] %s1937_s19  ;;  %s2065_s0 = sadd.s32 4294967295, %s1957_s24   ;;  %s1957_s24 = sphi %s2044_s24, %s32_s24   ;;  %s1953_s23 = sphi %s2042_s23, %s2490_s23   ;;  %s1949_s22 = sphi %s2040_s22, %s2489_s22   ;;  %s1945_s21 = sphi %s2038_s21, %s2488_s21   ;;  %s1941_s20 = sphi %s2036_s20, %s2492_s20   ;;  %s1937_s19 = sphi %s2034_s19, %s2491_s19  }
  0x11   : > { %2458 = sst [smem:[#allocation20_spill]] %s1945_s21  ;;  %s1299_s25 = sadd.s32 4294967294, %s1957_s24  }
  0x12   : > { %2459 = sst [smem:[#allocation21_spill]] %s1953_s23  ;;  %p87_p0 = scmp.ne.s32.totalorder %s1941_s20, %s1937_s19 }
  0x13   : > { %p2440_p1 = scmp.eq.s32.totalorder %s2065_s0, 0  ;;  %p321_p3 = scmp.eq.s32.totalorder %s1299_s25, 1 }
  0x14   : > { %p1300_p5 = scmp.ge.s32.totalorder %s1957_s24, 1  ;;  %p328_p7 = scmp.lt.s32.totalorder %s1957_s24, 3 }
  0x15   : > { %p2074_p4 = por %p2440_p1, %p87_p0  ;;  %p2079_p6 = por %p321_p3, %p87_p0 }
  0x16   : > { %p2084_p8 = pnand %p1300_p5, %p328_p7  ;;  %s1959_s29 = smov [#allocation10]  }
  0x17   : > { %s2460_s26 = scalar_select %p2074_p4, 1, 0 }
  0x18   : > { %s2461_s27 = scalar_select %p2079_p6, 1, 0 }
  0x19   : > { %s343_s30 = sshll.u32 %s1959_s29, 4  ;;  %p1656_p9 = pneg %p2084_p8  ;;  %s2088_s30 = int_to_ptr.vmem [resolvable:$true] %s343_s30 }
  0x1a   : > { %2462 = sst [smem:[#allocation22_spill]] %s2461_s27  ;;  %s1960_s13 = smov [#allocation11]  }
  0x1b   : > { %p2095_p11 = pnand %p1656_p9, %p2440_p1  ;;  %s365_s14 = sshll.u32 %s1960_s13, 4  ;;  %s2099_s14 = int_to_ptr.vmem [resolvable:$true] %s365_s14 }
  0x1c   : > { %s2465_s3 = sld [smem:[#allocation26_spill]] }
  0x1d   : > { %p1749_p13 = pneg %p2095_p11 }
  0x22   : > { %s1747_s17 = scalar_lea.hbm %s2465_s3, 6144 }
  0x23   : > { %p1748_p12 = scmp.ne.s32.totalorder %s2465_s3, %s1747_s17  ;;  %p1754_p5 = scmp.lt.u32.totalorder %s1747_s17, %s2465_s3 }
  0x25   : > { %p1750_p0 = pnand %p1749_p13, %p1748_p12 }
  0x27   : > { %p1751_p3 = pneg %p1750_p0 }
  0x29   : > { %p1756_p7 = pnand %p1754_p5, %p1751_p3 }
  0x2b   : > { %1759 = shalt.err (!%p1756_p7)
}
  0x2c   : > { %s1760_s13 = scalar_lea.vmem %s2088_s30, 6144  ;;  %p1768_p2 = scmp.lt.s32.totalorder %s2088_s30, %s2088_s30 }
  0x2d   : > { %p1761_p9 = scmp.ne.s32.totalorder %s2088_s30, %s1760_s13  ;;  %p1769_p12 = scmp.lt.s32.totalorder %s1760_s13, %s1760_s13 }
  0x2f   : > { %p1763_p10 = pnand %p1761_p9, %p1749_p13  ;;  %p1770_p0 = por %p1769_p12, %p1768_p2 }
  0x31   : > { %p1764_p1 = pneg %p1763_p10 }
  0x33   : > { %p1771_p6 = pnand %p1770_p0, %p1764_p1 }
  0x35   : > { %1774 = shalt.err (!%p1771_p6)
}
  0x36   : > { %s2443_s27 = smov 128   ;;  %s2445_s15 = smov 8  }
  0x37   : > { %1659 = dma.hbm_to_vmem [thread:$0]  (!%p2095_p11), %s2465_s3, 6144, %s2088_s30, [#allocation9], %s2443_s27, %s2443_s27, %s2445_s15  }
  0x38   : > { %s2466_s7 = sld [smem:[#allocation27_spill]] }
  0x3e   : > { %s1775_s29 = scalar_lea.hbm %s2466_s7, 6144 }
  0x3f   : > { %p1776_p1 = scmp.ne.s32.totalorder %s2466_s7, %s1775_s29  ;;  %p1782_p10 = scmp.lt.u32.totalorder %s1775_s29, %s2466_s7 }
  0x41   : > { %p1778_p2 = pnand %p1776_p1, %p1749_p13 }
  0x43   : > { %p1779_p6 = pneg %p1778_p2 }
  0x45   : > { %p1784_p3 = pnand %p1782_p10, %p1779_p6 }
  0x47   : > { %1787 = shalt.err (!%p1784_p3)
}
  0x48   : > { %s1788_s30 = scalar_lea.vmem %s2099_s14, 6144  ;;  %p1796_p12 = scmp.lt.s32.totalorder %s2099_s14, %s2099_s14 }
  0x49   : > { %p1789_p5 = scmp.ne.s32.totalorder %s2099_s14, %s1788_s30  ;;  %p1797_p0 = scmp.lt.s32.totalorder %s1788_s30, %s1788_s30 }
  0x4b   : > { %p1791_p7 = pnand %p1789_p5, %p1749_p13  ;;  %p1798_p1 = por %p1797_p0, %p1796_p12 }
  0x4d   : > { %p1792_p9 = pneg %p1791_p7 }
  0x4f   : > { %p1799_p2 = pnand %p1798_p1, %p1792_p9 }
  0x51   : > { %1802 = shalt.err (!%p1799_p2)
}
  0x52   : > { %1662 = dma.hbm_to_vmem [thread:$0]  (!%p2095_p11), %s2466_s7, 6144, %s2099_s14, [#allocation12], %s2443_s27, %s2443_s27, %s2445_s15  }
  0x53   : > { %s44_s19 = sadd.s32 1, %s1953_s23  ;;  %s74_s12 = sadd.s32 1, %s1945_s21 }
  0x54   : > { %p46_p13 = scmp.ge.s32.totalorder %s44_s19, 2  ;;  %p81_p6 = scmp.ne.s32.totalorder %s1945_s21, %s1941_s20 }
  0x55   : > { %p82_p10 = scmp.eq.s32.totalorder %s1957_s24, 0  ;;  %p1676_p3 = scmp.lt.s32.totalorder %s1957_s24, 2 }
  0x56   : > { %s2494_s19 = smov (%p46_p13, %s44_s19), 0  ;;  %p2468_p7 = scmp.eq.s32.totalorder %s2065_s0, 1 }
  0x57   : > { %2467 = sst [smem:[#allocation23_spill]] %s2494_s19  ;;  %p83_p5 = por %p82_p10, %p81_p6 }
  0x58   : > { %p2169_p9 = por %p2468_p7, %p81_p6  ;;  %s69_s17 = ssub.s32 %s1953_s23, %s2494_s19 }
  0x59   : > { %s388_s18 = sand.u32 1, %s1945_s21   ;;  %p72_p12 = scmp.eq.s32.totalorder %s69_s17, 0 }
  0x5a   : > { %s2469_s16 = scalar_select %p2169_p9, 1, 0 }
  0x5b   : > { %s2176_s14 = sshll.u32 %s388_s18, 4  ;;  %s1327_s25 = sshll.u32 %s1953_s23, 8 }
  0x5c   : > { %s2180_s29 = scalar_select %p72_p12, %s1945_s21, %s74_s12  }
  0x5d   : > { %s2471_s1 = sld [smem:[#allocation25_spill]]  ;;  %s392_s11 = scalar_lea.vmem [#allocation5], %s2176_s14 }
  0x5e   : > { %2470 = sst [smem:[#allocation24_spill]] %s2180_s29  ;;  %s401_s27 = sshll.u32 %s392_s11, 4  ;;  %s2194_s27 = int_to_ptr.vmem [resolvable:$true] %s401_s27 }
  0x5f   : > { %p2190_p11 = pnand %p1676_p3, %p83_p5  ;;  %s2199_s13 = scalar_lea.hbm %s2429_s2, %s1327_s25 }
  0x60   : > { %s2201_s30 = scalar_lea.sflag [#allocation6], %s388_s18 }
  0x61   : > { %p1805_p1 = pneg %p2190_p11 }
  0x63   : > { %s2185_s10 = scalar_lea.hbm %s2471_s1, %s1327_s25  ;;  %s1808_s19 = scalar_lea.hbm %s2471_s1, 512 }
  0x64   : > { %s1803_s3 = scalar_lea.hbm %s2185_s10, 256  ;;  %p1809_p6 = scmp.lt.u32.totalorder %s2185_s10, %s2471_s1 }
  0x65   : > { %p1804_p0 = scmp.ne.s32.totalorder %s2185_s10, %s1803_s3  ;;  %p1810_p10 = scmp.lt.u32.totalorder %s1808_s19, %s1803_s3 }
  0x66   : > { %p1812_p5 = scmp.lt.u32.totalorder %s1803_s3, %s2185_s10 }
  0x67   : > { %p1806_p2 = pnand %p1805_p1, %p1804_p0  ;;  %p1811_p3 = por %p1810_p10, %p1809_p6 }
  0x69   : > { %p1807_p13 = pneg %p1806_p2  ;;  %p1813_p7 = por %p1812_p5, %p1811_p3 }
  0x6b   : > { %p1814_p12 = pnand %p1813_p7, %p1807_p13 }
  0x6d   : > { %1817 = shalt.err (!%p1814_p12)
}
  0x6e   : > { %s1818_s15 = scalar_lea.vmem %s2194_s27, 256  ;;  %s1963_s7 = smov [#allocation5]  }
  0x6f   : > { %p1819_p0 = scmp.ne.s32.totalorder %s2194_s27, %s1818_s15  ;;  %s1823_s18 = sshll.u32 %s1963_s7, 4  ;;  %s1824_s18 = int_to_ptr.vmem [resolvable:$false] %s1823_s18 }
  0x70   : > { %s1825_s23 = scalar_lea.vmem %s1824_s18, 512  ;;  %p1826_p4 = scmp.lt.s32.totalorder %s2194_s27, %s1824_s18 }
  0x71   : > { %p1821_p2 = pnand %p1819_p0, %p1805_p1  ;;  %p1827_p6 = scmp.lt.s32.totalorder %s1825_s23, %s1818_s15 }
  0x73   : > { %p1822_p9 = pneg %p1821_p2  ;;  %p1828_p10 = por %p1827_p6, %p1826_p4 }
  0x75   : > { %p1829_p3 = pnand %p1828_p10, %p1822_p9 }
  0x77   : > { %1832 = shalt.err (!%p1829_p3)
}
  0x78   : > { %s2473_s3 = smov 8   ;;  %s2474_s19 = smov 128  }
  0x79   : > { %1666 = dma.hbm_to_vmem [thread:$0]  (!%p2190_p11), %s2185_s10, 256, %s2194_s27, %s2201_s30, %s2474_s19, %s2474_s19, %s2473_s3  }
  0x7a   : > { %s415_s25 = scalar_lea.vmem [#allocation8], %s2176_s14  ;;  %s411_s12 = sand.u32 1, %s1957_s24  }
  0x7b   : > { %s427_s29 = sshll.u32 %s415_s25, 4  ;;  %s2236_s11 = scalar_lea.sflag [#allocation9], %s411_s12  ;;  %s2234_s29 = int_to_ptr.vmem [resolvable:$true] %s427_s29 }
  0x7c   : > { %s1833_s15 = scalar_lea.hbm %s2199_s13, 256  ;;  %s1838_s23 = scalar_lea.hbm %s2429_s2, 512 }
  0x7d   : > { %p1834_p4 = scmp.ne.s32.totalorder %s2199_s13, %s1833_s15  ;;  %p1839_p5 = scmp.lt.u32.totalorder %s2199_s13, %s2429_s2 }
  0x7e   : > { %p1840_p7 = scmp.lt.u32.totalorder %s1838_s23, %s1833_s15  ;;  %p1842_p0 = scmp.lt.u32.totalorder %s1833_s15, %s2199_s13 }
  0x7f   : > { %p1836_p9 = pnand %p1834_p4, %p1805_p1 }
  0x80   : > { %p1841_p12 = por %p1840_p7, %p1839_p5 }
  0x81   : > { %p1837_p13 = pneg %p1836_p9 }
  0x82   : > { %p1843_p2 = por %p1842_p0, %p1841_p12 }
  0x84   : > { %p1844_p6 = pnand %p1843_p2, %p1837_p13 }
  0x86   : > { %1847 = shalt.err (!%p1844_p6)
}
  0x87   : > { %s1848_s27 = scalar_lea.vmem %s2234_s29, 256  ;;  %s1964_s14 = smov [#allocation8]  }
  0x88   : > { %p1849_p10 = scmp.ne.s32.totalorder %s2234_s29, %s1848_s27  ;;  %s1853_s10 = sshll.u32 %s1964_s14, 4  ;;  %s1854_s10 = int_to_ptr.vmem [resolvable:$false] %s1853_s10 }
  0x89   : > { %s1855_s1 = scalar_lea.vmem %s1854_s10, 512  ;;  %p1856_p9 = scmp.lt.s32.totalorder %s2234_s29, %s1854_s10 }
  0x8a   : > { %p1851_p3 = pnand %p1849_p10, %p1805_p1  ;;  %p1857_p5 = scmp.lt.s32.totalorder %s1855_s1, %s1848_s27 }
  0x8c   : > { %p1852_p4 = pneg %p1851_p3  ;;  %p1858_p7 = por %p1857_p5, %p1856_p9 }
  0x8e   : > { %p1859_p12 = pnand %p1858_p7, %p1852_p4 }
  0x90   : > { %1862 = shalt.err (!%p1859_p12)
}
  0x91   : > { %1669 = dma.hbm_to_vmem [thread:$0]  (!%p2190_p11), %s2199_s13, 256, %s2234_s29, %s2236_s11, %s2474_s19, %s2474_s19, %s2473_s3  }
  0x92   : > { %439 = sbr.rel (%p2084_p8) target bundleno = 1020 (0x3fc), region = 64  ;;  %s2268_s21 = sand.u32 (!%p2084_p8), 1, %s1941_s20  }
  0x93   : > { %s1311_s30 = sshll.u32 (!%p2084_p8), %s2268_s21, 4  ;;  %s442_s25 = scalar_lea.sflag (!%p2084_p8), [#allocation6], %s2268_s21 }
  0x94   : > { %s2274_s17 = scalar_lea.vmem (!%p2084_p8), [#allocation5], %s1311_s30  ;;  %p2475_p1 = scmp.ne.s32.totalorder (!%p2084_p8), %s2460_s26, 0 }
  0x99   : > { %1916 = dma.done.wait (%p2475_p1), %s442_s25, 256  }
  0x9a   : > { %1918 = vsyncadd (%p2475_p1), %s442_s25, 4294967040  ;;  %s450_s28 = sand.u32 1, %s2065_s0  }
  0x9b   : > { %s451_s13 = scalar_lea.sflag [#allocation9], %s450_s28 }
  0x9c   : > { %1920 = dma.done.wait (%p2475_p1), %s451_s13, 256  }
  0x9d   : > { %1922 = vsyncadd (%p2475_p1), %s451_s13, 4294967040  ;;  %p2476_p8 = scmp.eq.s32.totalorder %s2065_s0, 0 }
  0x9f   : > { %1924 = dma.done.wait (%p2476_p8), [#allocation9], 6144   ;;  %p2477_p11 = pmov %p2476_p8 }
  0xa0   : > { %p2478_p13 = pmov %p2476_p8 }
  0xa1   : > { %1926 = vsyncadd (%p2477_p11), [#allocation9], 4294961152 }
  0xa2   : > { %1928 = dma.done.wait (%p2478_p13), [#allocation12], 6144   ;;  %p2479_p0 = pmov %p2476_p8 }
  0xa3   : > { %v1965_v0 = vmov 0.0|0.0   ;;  %v1966_v1 = vmov 0.0   ;;  %vm1967_vm0 = vmmov 0   ;;  %v588_v2 = vld [vmem:[#allocation10 + $0x80] sm:$0xff]  ;;  %v589_v3 = vld [vmem:[#allocation10 + $0x88] sm:$0xff]  ;;  %v590_v7 = vld [vmem:[#allocation10 + $0x90] sm:$0xff] }
  0xa4   : > { %1930 = vsyncadd (%p2479_p0), [#allocation12], 4294961152  ;;  %1554 = vmatprep.subr.bf16.mxu1 %v1965_v0  ;;  %691 = vmatprep.mubr.f32.mxu0 %v1966_v1  ;;  %559 = vst [vmem:[#allocation2 + $0x18] sm:$0x3] %v1966_v1  ;;  %v572_v4 = vld [vmem:[#allocation10] sm:$0xff]  ;;  %v1522_v5 = vpack.c.bf16 %v589_v3, %v588_v2  ;;  %v573_v6 = vld [vmem:[#allocation10 + $0x8] sm:$0xff] }
  0xa5   : > { %561 = vst [vmem:[#allocation2 + $0x20] sm:$0x1] %v1966_v1  ;;  %1478 = vmatprep.mubr.msk.f32.mxu1 %vm1967_vm0, %v1966_v1  ;;  %v591_v8 = vld [vmem:[#allocation10 + $0x98] sm:$0xff]  ;;  %v1524_v9 = vpack.c.bf16 %v573_v6, %v572_v4  ;;  %v574_v11 = vld [vmem:[#allocation10 + $0x10] sm:$0xff]  ;;  %v604_v13 = vld [vmem:[#allocation10 + $0x100] sm:$0xff]  ;;  %vm528_vm1 = vcmask 1040384  }
  0xa6   : > { %v1526_v10 = vpack.c.bf16 %v591_v8, %v590_v7  ;;  %v575_v12 = vld [vmem:[#allocation10 + $0x18] sm:$0xff]  ;;  %1523 = vmatprep.subr.bf16.mxu0 %v1522_v5  ;;  %v605_v14 = vld [vmem:[#allocation10 + $0x108] sm:$0xff]  ;;  %v592_v15 = vld [vmem:[#allocation10 + $0xa0] sm:$0xff]  ;;  %vm516_vm2 = vcmask 1041408   ;;  %vm855_vm3 = vcmask 1043456   ;;  %s1140_s7 = sld [smem:[#allocation4]] }
  0xa7   : > { %v593_v16 = vld [vmem:[#allocation10 + $0xa8] sm:$0xff]  ;;  %1525 = vmatpush3.bf16.msra.mxu0 %v1524_v9  ;;  %v1528_v17 = vpack.c.bf16 %v575_v12, %v574_v11  ;;  %v1555_v18 = vpack.c.bf16 %v605_v14, %v604_v13  ;;  %v606_v19 = vld [vmem:[#allocation10 + $0x110] sm:$0xff]  ;;  %v576_v21 = vld [vmem:[#allocation10 + $0x20] sm:$0xff]  ;;  %s2480_s10 = sld [smem:[#allocation28_spill]]  ;;  %s1329_s1 = sshll.u32 %s1949_s22, 8 }
  0xa8   : > { %1527 = vmatprep.subr.bf16.mxu0 %v1526_v10  ;;  %v1530_v20 = vpack.c.bf16 %v593_v16, %v592_v15  ;;  %v577_v22 = vld [vmem:[#allocation10 + $0x28] sm:$0xff]  ;;  %v607_v23 = vld [vmem:[#allocation10 + $0x118] sm:$0xff]  ;;  %v594_v25 = vld [vmem:[#allocation10 + $0xb0] sm:$0xff]  ;;  %s505_s25 = scalar_lea.vmem [#allocation13], %s1311_s30  ;;  %s2481_s0 = sld [smem:[#allocation29_spill]] }
  0xa9   : > { %1556 = vmatpush3.bf16.msra.mxu1 %v1555_v18  ;;  %v1558_v24 = vpack.c.bf16 %v607_v23, %v606_v19  ;;  %v595_v26 = vld [vmem:[#allocation10 + $0xb8] sm:$0xff]  ;;  %v608_v27 = vld [vmem:[#allocation10 + $0x120] sm:$0xff]  ;;  %v609_v28 = vld [vmem:[#allocation10 + $0x128] sm:$0xff]  ;;  %v1532_v29 = vpack.c.bf16 %v577_v22, %v576_v21  ;;  %s1151_s3 = scalar_lea.sflag [#allocation7], %s2268_s21  ;;  %p2482_p6 = scmp.ne.s32.totalorder %s2469_s16, 0 }
  0xaa   : > { %1557 = vmatprep.subr.bf16.mxu1 %v1965_v0  ;;  %v1534_v30 = vpack.c.bf16 %v595_v26, %v594_v25  ;;  %v578_v31 = vld [vmem:[#allocation10 + $0x30] sm:$0xff]  ;;  %v579_v32 = vld [vmem:[#allocation10 + $0x38] sm:$0xff]  ;;  %v1561_v33 = vpack.c.bf16 %v609_v28, %v608_v27  ;;  %v596_v34 = vld [vmem:[#allocation10 + $0xc0] sm:$0xff]  ;;  %s1968_s30 = smov [#allocation13]  }
  0xab   : > { %1529 = vmatpush3.bf16.msra.mxu0 %v1528_v17  ;;  %v597_v35 = vld [vmem:[#allocation10 + $0xc8] sm:$0xff]  ;;  %v610_v36 = vld [vmem:[#allocation10 + $0x130] sm:$0xff]  ;;  %v611_v37 = vld [vmem:[#allocation10 + $0x138] sm:$0xff]  ;;  %v1536_v38 = vpack.c.bf16 %v579_v32, %v578_v31  ;;  %s1867_s19 = sshll.u32 %s1968_s30, 4  ;;  %s1868_s19 = int_to_ptr.vmem [resolvable:$false] %s1867_s19 }
  0xac   : > { %1531 = vmatprep.subr.bf16.mxu0 %v1530_v20  ;;  %v580_v39 = vld [vmem:[#allocation10 + $0x40] sm:$0xff]  ;;  %v1538_v40 = vpack.c.bf16 %v597_v35, %v596_v34  ;;  %v581_v41 = vld [vmem:[#allocation10 + $0x48] sm:$0xff]  ;;  %v598_v42 = vld [vmem:[#allocation10 + $0xd0] sm:$0xff]  ;;  %v1564_v44 = vpack.c.bf16 %v611_v37, %v610_v36  ;;  %s1869_s29 = scalar_lea.vmem %s1868_s19, 512 }
  0xad   : > { %1559 = vmatpush3.bf16.msra.mxu1 %v1558_v24  ;;  %v599_v43 = vld [vmem:[#allocation10 + $0xd8] sm:$0xff]  ;;  %v582_v45 = vld [vmem:[#allocation10 + $0x50] sm:$0xff]  ;;  %v612_v46 = vld [vmem:[#allocation10 + $0x140] sm:$0xff]  ;;  %v1540_v48 = vpack.c.bf16 %v581_v41, %v580_v39 }
  0xae   : > { %1560 = vmatprep.subr.bf16.mxu1 %v1965_v0  ;;  %v613_v47 = vld [vmem:[#allocation10 + $0x148] sm:$0xff]  ;;  %v1542_v49 = vpack.c.bf16 %v599_v43, %v598_v42  ;;  %v2303_v50 = vld [vmem:[%s2274_s17] sm:$0xff]  ;;  %v583_v53 = vld [vmem:[#allocation10 + $0x58] sm:$0xff]  ;;  %s2375_s26 = scalar_lea.hbm %s2481_s0, %s1329_s1 }
  0xaf   : > { %1533 = vmatpush3.bf16.msra.mxu0 %v1532_v29  ;;  %v525_v51 = vld [vmem:[%s2274_s17 + $0x8] sm:$0x7f]  ;;  %v529_v54 = vrot.slane %v2303_v50, 7  ;;  %v517_v55 = vrot.slane %v2303_v50, 6  ;;  %v1567_v59 = vpack.c.bf16 %v613_v47, %v612_v46  ;;  %v600_v60 = vld [vmem:[#allocation10 + $0xe0] sm:$0xff]  ;;  %v614_v62 = vld [vmem:[#allocation10 + $0x150] sm:$0xff]  ;;  %v1544_v4 = vpack.c.bf16 %v583_v53, %v582_v45 }
  0xb0   : > { %1535 = vmatprep.subr.bf16.mxu0 %v1534_v30  ;;  %v513_v52 = vld [vmem:[%s2274_s17 + $0x8] sm:$0x3f]  ;;  %v530_v56 = vrot.slane %v525_v51, 7  ;;  %v584_v6 = vld [vmem:[#allocation10 + $0x60] sm:$0xff]  ;;  %v602_v9 = vld [vmem:[#allocation10 + $0xf0] sm:$0xff] }
  0xb1   : > { %1562 = vmatpush3.bf16.msra.mxu1 %v1561_v33  ;;  %v518_v57 = vrot.slane %v513_v52, 6  ;;  %v2310_v58 = vld [vmem:[%s2274_s17 + $0x8] sm:$0xff]  ;;  %534 = vst [vmem:[#allocation2 + $0x20] sm:$0xfe] %v529_v54  ;;  %522 = vst [vmem:[#allocation2 + $0x18] sm:$0xfc] %v517_v55 }
  0xb2   : > { %1563 = vmatprep.subr.bf16.mxu1 %v1965_v0  ;;  %v601_v61 = vld [vmem:[#allocation10 + $0xe8] sm:$0xff]  ;;  %v615_v63 = vld [vmem:[#allocation10 + $0x158] sm:$0xff]  ;;  %v531_v2 = vsel %vm528_vm1, %v529_v54, %v530_v56  ;;  %v616_v11 = vld [vmem:[#allocation10 + $0x160] sm:$0xff]  ;;  %s1166_s17 = sshll.u32 %s505_s25, 4  ;;  %s2377_s17 = int_to_ptr.vmem [resolvable:$true] %s1166_s17 }
  0xb3   : > { %1537 = vmatpush3.bf16.msra.mxu0 %v1536_v38  ;;  %v519_v3 = vsel %vm516_vm2, %v517_v55, %v518_v57  ;;  %v1546_v5 = vpack.c.bf16 %v601_v61, %v600_v60  ;;  %v585_v7 = vld [vmem:[#allocation10 + $0x68] sm:$0xff]  ;;  %v1570_v8 = vpack.c.bf16 %v615_v63, %v614_v62  ;;  %v603_v10 = vld [vmem:[#allocation10 + $0xf8] sm:$0xff]  ;;  %v586_v15 = vld [vmem:[#allocation10 + $0x70] sm:$0xff]  ;;  %s1863_s22 = scalar_lea.vmem %s2377_s17, 256  ;;  %p1870_p4 = scmp.lt.s32.totalorder %s2377_s17, %s1868_s19 }
  0xb4   : > { %1539 = vmatprep.subr.bf16.mxu0 %v1538_v40  ;;  %v617_v12 = vld [vmem:[#allocation10 + $0x168] sm:$0xff]  ;;  %v1548_v13 = vpack.c.bf16 %v585_v7, %v584_v6  ;;  %v1550_v14 = vpack.c.bf16 %v603_v10, %v602_v9  ;;  %v587_v16 = vld [vmem:[#allocation10 + $0x78] sm:$0xff]  ;;  %v618_v18 = vld [vmem:[#allocation10 + $0x170] sm:$0xff]  ;;  %p1864_p2 = scmp.ne.s32.totalorder %s2377_s17, %s1863_s22  ;;  %p1871_p9 = scmp.lt.s32.totalorder %s1869_s29, %s1863_s22 }
  0xb5   : > { %1565 = vmatpush3.bf16.msra.mxu1 %v1564_v44  ;;  %v1573_v17 = vpack.c.bf16 %v617_v12, %v616_v11  ;;  %v619_v19 = vld [vmem:[#allocation10 + $0x178] sm:$0xff]  ;;  %v1552_v20 = vpack.c.bf16 %v587_v16, %v586_v15  ;;  %v1316_v25 = vld [vmem:[%s2431_s4] ss:$0 sm:$0xff]  ;;  %v921_v52 = vld [vmem:[#allocation11 + $0x110] sm:$0xff] }
  0xb6   : > { %1566 = vmatprep.subr.bf16.mxu1 %v1965_v0  ;;  %v1576_v21 = vpack.c.bf16 %v619_v19, %v618_v18  ;;  %v922_v53 = vld [vmem:[#allocation11 + $0x118] sm:$0xff]  ;;  %v923_v55 = vld [vmem:[#allocation11 + $0x120] sm:$0xff]  ;;  %v924_v56 = vld [vmem:[#allocation11 + $0x128] sm:$0xff]  ;;  %p1865_p10 = pnand %p1864_p2, %p2482_p6  ;;  %p1872_p5 = por %p1871_p9, %p1870_p4 }
  0xb7   : > { %1541 = vmatpush3.bf16.msra.mxu0 %v1540_v48  ;;  %v919_v48 = vld [vmem:[#allocation11 + $0x100] sm:$0xff]  ;;  %v1614_v54 = vpack.c.bf16 %v922_v53, %v921_v52  ;;  %v1618_v60 = vpack.c.bf16 %v924_v56, %v923_v55  ;;  %v888_v63 = vld [vmem:[#allocation11 + $0x8] sm:$0xff]  ;;  %v906_v6 = vld [vmem:[#allocation11 + $0x98] sm:$0xff] }
  0xb8   : > { %1543 = vmatprep.subr.bf16.mxu0 %v1542_v49  ;;  %v567_v22 = vld [vmem:[#allocation2 + $0x20] sm:$0xff]  ;;  %v566_v23 = vld [vmem:[#allocation2 + $0x18] sm:$0xff]  ;;  %v889_v9 = vld [vmem:[#allocation11 + $0x10] sm:$0xff]  ;;  %p1866_p3 = pneg %p1865_p10 }
  0xb9   : > { %1568 = vmatpush3.bf16.msra.mxu1 %v1567_v59  ;;  %v920_v49 = vld [vmem:[#allocation11 + $0x108] sm:$0xff]  ;;  %v903_v57 = vld [vmem:[#allocation11 + $0x80] sm:$0xff]  ;;  %v890_v10 = vld [vmem:[#allocation11 + $0x18] sm:$0xff] }
  0xba   : > { %1569 = vmatprep.subr.bf16.mxu1 %v1965_v0  ;;  %v1610_v51 = vpack.c.bf16 %v920_v49, %v919_v48  ;;  %v904_v59 = vld [vmem:[#allocation11 + $0x88] sm:$0xff]  ;;  %v887_v62 = vld [vmem:[#allocation11] sm:$0xff]  ;;  %v1584_v11 = vpack.c.bf16 %v890_v10, %v889_v9  ;;  %v898_v48 = vld [vmem:[#allocation11 + $0x58] sm:$0xff]  ;;  %p1873_p7 = pnand %p1872_p5, %p1866_p3 }
  0xbb   : > { %1545 = vmatpush3.bf16.msra.mxu0 %v1544_v4  ;;  %v1578_v61 = vpack.c.bf16 %v904_v59, %v903_v57  ;;  %v926_v4 = vld [vmem:[#allocation11 + $0x138] sm:$0xff]  ;;  %v927_v12 = vld [vmem:[#allocation11 + $0x140] sm:$0xff]  ;;  %v908_v15 = vld [vmem:[#allocation11 + $0xa8] sm:$0xff] }
  0xbc   : > { %1547 = vmatprep.subr.bf16.mxu0 %v1546_v5  ;;  %v905_v5 = vld [vmem:[#allocation11 + $0x90] sm:$0xff]  ;;  %v891_v18 = vld [vmem:[#allocation11 + $0x20] sm:$0xff]  ;;  %v892_v19 = vld [vmem:[#allocation11 + $0x28] sm:$0xff] }
  0xbd   : > { %1571 = vmatpush3.bf16.msra.mxu1 %v1570_v8  ;;  %v1582_v8 = vpack.c.bf16 %v906_v6, %v905_v5  ;;  %v916_v52 = vld [vmem:[#allocation11 + $0xe8] sm:$0xff]  ;;  %v917_v57 = vld [vmem:[#allocation11 + $0xf0] sm:$0xff]  ;;  %v918_v59 = vld [vmem:[#allocation11 + $0xf8] sm:$0xff] }
  0xbe   : > { %1572 = vmatprep.subr.bf16.mxu1 %v1965_v0  ;;  %v900_v55 = vld [vmem:[#allocation11 + $0x68] sm:$0xff] }
  0xbf   : > { %1549 = vmatpush3.bf16.msra.mxu0 %v1548_v13  ;;  %v928_v13 = vld [vmem:[#allocation11 + $0x148] sm:$0xff] }
  0xc0   : > { %1551 = vmatprep.subr.bf16.mxu0 %v1550_v14  ;;  %v907_v14 = vld [vmem:[#allocation11 + $0xa0] sm:$0xff]  ;;  %v1626_v16 = vpack.c.bf16 %v928_v13, %v927_v12 }
  0xc1   : > { %1574 = vmatpush3.bf16.msra.mxu1 %v1573_v17  ;;  %v1586_v17 = vpack.c.bf16 %v908_v15, %v907_v14 }
  0xc2   : > { %1575 = vmatprep.subr.bf16.mxu1 %v1965_v0 }
  0xc3   : > { %1553 = vmatpush3.bf16.msra.mxu0 %v1552_v20  ;;  %v1588_v20 = vpack.c.bf16 %v892_v19, %v891_v18 }
  0xc4   : > { %1579 = vmatprep.subr.bf16.mxu0 %v1578_v61  ;;  %v901_v61 = vld [vmem:[#allocation11 + $0x70] sm:$0xff] }
  0xc5   : > { %1577 = vmatpush3.bf16.msra.mxu1 %v1576_v21  ;;  %v929_v21 = vld [vmem:[#allocation11 + $0x150] sm:$0xff] }
  0xc6   : > { %692 = vmatmul.mubr.f32.vlgmr.msra.gmra.mrb[0].mxu0 %v1966_v1  ;;  %1611 = vmatprep.subr.bf16.mxu1 %v1610_v51 }
  0xc7   : > { %696 = vmatprep.mubr.f32.mxu0 %v567_v22  ;;  %v930_v22 = vld [vmem:[#allocation11 + $0x158] sm:$0xff] }
  0xc8   : > { %1479 = vmatmul.mubr.f32.vlgmr.msra.gmra.mrb[0].mxu1 %v1966_v1 }
  0xc9   : > { %1481 = vmatprep.mubr.msk.f32.mxu1 %vm1967_vm0, %v1966_v1  ;;  %1613 = vmatpush3.bf16.msra.mxu1 %v1610_v51  ;;  %v915_v51 = vld [vmem:[#allocation11 + $0xe0] sm:$0xff] }
  0xca   : > { %697 = vmatmul.mubr.f32.gmra.mrb[2].mxu0 %v566_v23  ;;  %1615 = vmatprep.subr.bf16.mxu1 %v1614_v54  ;;  %v909_v23 = vld [vmem:[#allocation11 + $0xb0] sm:$0xff]  ;;  %v1602_v53 = vpack.c.bf16 %v916_v52, %v915_v51 }
  0xcb   : > { %701 = vmatprep.mubr.f32.mxu0 %v531_v2  ;;  %v1580_v2 = vpack.c.bf16 %v888_v63, %v887_v62  ;;  %v902_v62 = vld [vmem:[#allocation11 + $0x78] sm:$0xff] }
  0xcc   : > { %1482 = vmatmul.mubr.f32.gmra.mrb[2].mxu1 %v2303_v50  ;;  %v1608_v63 = vpack.c.bf16 %v902_v62, %v901_v61 }
  0xcd   : > { %1484 = vmatprep.mubr.msk.f32.mxu1 %vm1967_vm0, %v1966_v1  ;;  %1617 = vmatpush3.bf16.msra.mxu1 %v1614_v54  ;;  %v899_v54 = vld [vmem:[#allocation11 + $0x60] sm:$0xff] }
  0xce   : > { %702 = vmatmul.mubr.f32.gmra.mrb[4].mxu0 %v519_v3  ;;  %1619 = vmatprep.subr.bf16.mxu1 %v1618_v60  ;;  %v925_v3 = vld [vmem:[#allocation11 + $0x130] sm:$0xff]  ;;  %v1604_v56 = vpack.c.bf16 %v900_v55, %v899_v54 }
  0xcf   : > { %1581 = vmatpush3.bf16.msra.mxu0 %v1580_v2  ;;  %v1622_v7 = vpack.c.bf16 %v926_v4, %v925_v3 }
  0xd0   : > { %1485 = vmatmul.mubr.f32.gmra.mrb[4].mxu1 %v2310_v58  ;;  %1583 = vmatprep.subr.bf16.mxu0 %v1582_v8 }
  0xd1   : > { %1621 = vmatpush3.bf16.msra.mxu1 %v1618_v60  ;;  %v1606_v60 = vpack.c.bf16 %v918_v59, %v917_v57 }
  0xd2   : > { %1623 = vmatprep.subr.bf16.mxu1 %v1622_v7 }
  0xd3   : > { %1585 = vmatpush3.bf16.msra.mxu0 %v1584_v11 }
  0xd4   : > { %1587 = vmatprep.subr.bf16.mxu0 %v1586_v17 }
  0xd5   : > { %1625 = vmatpush3.bf16.msra.mxu1 %v1622_v7 }
  0xd6   : > { %1627 = vmatprep.subr.bf16.mxu1 %v1626_v16 }
  0xd7   : > { %1589 = vmatpush3.bf16.msra.mxu0 %v1588_v20 }
  0xd9   : > { %1629 = vmatpush3.bf16.msra.mxu1 %v1626_v16 }
 0x199   : > { %v1362_v0 = vpop.f32.mrb[0].mxu0 }
 0x19a   : > { %v1363_v24 = vpop.f32.mrb[1].mxu0 }
 0x19b   : > { %v1364_v26 = vadd.f32 %v1363_v24, %v1362_v0  ;;  %v773_v27 = vpop.f32.mrb[0].mxu1  ;;  %v910_v0 = vld [vmem:[#allocation11 + $0xb8] sm:$0xff]  ;;  %v1630_v24 = vpack.c.bf16 %v930_v22, %v929_v21 }
 0x19c   : > { %v1480_v28 = vpop.f32.mrb[1].mxu1 }
 0x19d   : > { %v1365_v29 = vpop.f32.mrb[2].mxu0  ;;  %v694_v30 = vadd.f32 %v1364_v26, %v1316_v25  ;;  %v893_v26 = vld [vmem:[#allocation11 + $0x30] sm:$0xff]  ;;  %1631 = vmatprep.subr.bf16.mxu1 %v1630_v24 }
 0x19e   : > { %v1366_v31 = vpop.f32.mrb[3].mxu0  ;;  %1633 = vmatpush3.bf16.msra.mxu1 %v1630_v24 }
 0x19f   : > { %v2329_v32 = vadd.f32 %v773_v27, %v694_v30  ;;  %v1367_v33 = vadd.f32 %v1366_v31, %v1365_v29  ;;  %v778_v34 = vpop.f32.mrb[2].mxu1  ;;  %v894_v27 = vld [vmem:[#allocation11 + $0x38] sm:$0xff]  ;;  %v931_v29 = vld [vmem:[#allocation11 + $0x160] sm:$0xff]  ;;  %v932_v30 = vld [vmem:[#allocation11 + $0x168] sm:$0xff] }
 0x1a0   : > { %v1483_v35 = vpop.f32.mrb[3].mxu1  ;;  %v1592_v28 = vpack.c.bf16 %v894_v27, %v893_v26  ;;  %v911_v31 = vld [vmem:[#allocation11 + $0xc0] sm:$0xff]  ;;  %v1317_v27 = vld [vmem:[%s2432_s5] ss:$0 sm:$0xff] }
 0x1a1   : > { %789 = vadd.xlane.f32.xlu0 %v2329_v32  ;;  %v1368_v36 = vpop.f32.mrb[4].mxu0  ;;  %v699_v37 = vadd.f32 %v1367_v33, %v1316_v25  ;;  %v795_v38 = vmul.f32 %v2329_v32, %v2329_v32  ;;  %v912_v33 = vld [vmem:[#allocation11 + $0xc8] sm:$0xff] }
 0x1a2   : > { %v1369_v39 = vpop.f32.mrb[5].mxu0  ;;  %v1594_v35 = vpack.c.bf16 %v912_v33, %v911_v31 }
 0x1a3   : > { %v2334_v40 = vadd.f32 %v778_v34, %v699_v37  ;;  %v1370_v41 = vadd.f32 %v1369_v39, %v1368_v36  ;;  %798 = vadd.xlane.f32.xlu1 %v795_v38  ;;  %v783_v42 = vpop.f32.mrb[4].mxu1  ;;  %v1634_v34 = vpack.c.bf16 %v932_v30, %v931_v29  ;;  %v895_v36 = vld [vmem:[#allocation11 + $0x40] sm:$0xff]  ;;  %v896_v37 = vld [vmem:[#allocation11 + $0x48] sm:$0xff]  ;;  %v933_v39 = vld [vmem:[#allocation11 + $0x170] sm:$0xff] }
 0x1a4   : > { %v1486_v43 = vpop.f32.mrb[5].mxu1  ;;  %v1596_v38 = vpack.c.bf16 %v896_v37, %v895_v36  ;;  %v1318_v29 = vld [vmem:[%s2433_s6] ss:$0 sm:$0xff] }
 0x1a5   : > { %791 = vadd.xlane.f32.xlu0 %v2334_v40  ;;  %v704_v44 = vadd.f32 %v1370_v41, %v1316_v25  ;;  %v796_v45 = vmul.f32 %v2334_v40, %v2334_v40  ;;  %v1590_v25 = vpack.c.bf16 %v910_v0, %v909_v23  ;;  %1635 = vmatprep.subr.bf16.mxu1 %v1634_v34  ;;  %v934_v41 = vld [vmem:[#allocation11 + $0x178] sm:$0xff] }
 0x1a6   : > { %1637 = vmatpush3.bf16.msra.mxu1 %v1634_v34  ;;  %v914_v43 = vld [vmem:[#allocation11 + $0xd8] sm:$0xff] }
 0x1a7   : > { %v2339_v46 = vadd.f32 %v783_v42, %v704_v44  ;;  %800 = vadd.xlane.f32.xlu1 %v796_v45  ;;  %1591 = vmatprep.subr.bf16.mxu0 %v1590_v25  ;;  %v913_v42 = vld [vmem:[#allocation11 + $0xd0] sm:$0xff]  ;;  %v1638_v44 = vpack.c.bf16 %v934_v41, %v933_v39 }
 0x1a8   : > { %1593 = vmatpush3.bf16.msra.mxu0 %v1592_v28  ;;  %v1598_v45 = vpack.c.bf16 %v914_v43, %v913_v42 }
 0x1a9   : > { %793 = vadd.xlane.f32.xlu0 %v2339_v46  ;;  %v797_v47 = vmul.f32 %v2339_v46, %v2339_v46  ;;  %1595 = vmatprep.subr.bf16.mxu0 %v1594_v35 }
 0x1aa   : > { %1639 = vmatprep.subr.bf16.mxu1 %v1638_v44 }
 0x1ab   : > { %802 = vadd.xlane.f32.xlu1 %v797_v47  ;;  %v897_v47 = vld [vmem:[#allocation11 + $0x50] sm:$0xff]  ;;  %1641 = vmatpush3.bf16.msra.mxu1 %v1638_v44 }
 0x1ac   : > { %1597 = vmatpush3.bf16.msra.mxu0 %v1596_v38  ;;  %v1600_v49 = vpack.c.bf16 %v898_v48, %v897_v47 }
 0x1ad   : > { %1599 = vmatprep.subr.bf16.mxu0 %v1598_v45 }
 0x1b0   : > { %1601 = vmatpush3.bf16.msra.mxu0 %v1600_v49 }
 0x1b1   : > { %1603 = vmatprep.subr.bf16.mxu0 %v1602_v53 }
 0x1b4   : > { %1605 = vmatpush3.bf16.msra.mxu0 %v1604_v56 }
 0x1b5   : > { %1607 = vmatprep.subr.bf16.mxu0 %v1606_v60 }
 0x1b8   : > { %1609 = vmatpush3.bf16.msra.mxu0 %v1608_v63 }
 0x22e   : > { %v790_v2 = vpop.xlane.xlu0 %789 }
 0x22f   : > { %v804_v3 = vmul.f32 0.03125, %v790_v2 }
 0x230   : > { %v799_v4 = vpop.xlane.xlu1 %798 }
 0x231   : > { %v810_v5 = vmul.f32 %v804_v3, %v804_v3  ;;  %v807_v6 = vmul.f32 0.03125, %v799_v4  ;;  %v819_v25 = vsub.f32 %v2329_v32, %v804_v3 }
 0x232   : > { %v792_v7 = vpop.xlane.xlu0 %791 }
 0x233   : > { %v813_v8 = vsub.f32 %v807_v6, %v810_v5  ;;  %v805_v9 = vmul.f32 0.03125, %v792_v7 }
 0x234   : > { %v801_v10 = vpop.xlane.xlu1 %800 }
 0x235   : > { %v816_v11 = vmax.f32 %v813_v8, 0.0  ;;  %v811_v12 = vmul.f32 %v805_v9, %v805_v9  ;;  %v808_v13 = vmul.f32 0.03125, %v801_v10  ;;  %v820_v31 = vsub.f32 %v2334_v40, %v805_v9 }
 0x236   : > { %v794_v14 = vpop.xlane.xlu0 %793 }
 0x237   : > { %v822_v15 = vadd.f32 1e-08, %v816_v11  ;;  %v814_v16 = vsub.f32 %v808_v13, %v811_v12  ;;  %v806_v17 = vmul.f32 0.03125, %v794_v14 }
 0x238   : > { %v803_v18 = vpop.xlane.xlu1 %802 }
 0x239   : > { %1737 = vrsqrt.f32 %v822_v15  ;;  %v817_v19 = vmax.f32 %v814_v16, 0.0  ;;  %v812_v20 = vmul.f32 %v806_v17, %v806_v17  ;;  %v809_v21 = vmul.f32 0.03125, %v803_v18 }
 0x23a   : > { %v821_v32 = vsub.f32 %v2339_v46, %v806_v17 }
 0x23b   : > { %v823_v22 = vadd.f32 1e-08, %v817_v19  ;;  %v815_v23 = vsub.f32 %v809_v21, %v812_v20 }
 0x23d   : > { %1739 = vrsqrt.f32 %v823_v22  ;;  %v818_v0 = vmax.f32 %v815_v23, 0.0 }
 0x23f   : > { %v824_v24 = vadd.f32 1e-08, %v818_v0 }
 0x241   : > { %1741 = vrsqrt.f32 %v824_v24 }
 0x243   : > { %v1738_v26 = vpop.eup %1737 }
 0x244   : > { %v828_v28 = vmul.f32 %v1738_v26, %v819_v25 }
 0x246   : > { %v837_v30 = vmul.f32 %v1317_v27, %v828_v28  ;;  %v1320_v28 = vld [vmem:[%s2436_s9] ss:$0 sm:$0xff] }
 0x247   : > { %v1740_v33 = vpop.eup %1739 }
 0x248   : > { %v846_v34 = vadd.f32 %v1318_v29, %v837_v30  ;;  %v829_v35 = vmul.f32 %v1740_v33, %v820_v31  ;;  %v1321_v30 = vld [vmem:[%s2480_s10] ss:$0 sm:$0xff] }
 0x24a   : > { %v838_v36 = vmul.f32 %v1317_v27, %v829_v35  ;;  %v849_v38 = vmax.f32 %v846_v34, 0.0 }
 0x24b   : > { %v1742_v37 = vpop.eup %1741 }
 0x24c   : > { %v847_v39 = vadd.f32 %v1318_v29, %v838_v36  ;;  %v830_v41 = vmul.f32 %v1742_v37, %v821_v32  ;;  %v856_v44 = vrot.slane %v849_v38, 4  ;;  %v865_v45 = vrot.slane %v849_v38, 6 }
 0x24d   : > { %v1141_v32 = vstv %s1140_s7 }
 0x24e   : > { %v850_v42 = vmax.f32 %v847_v39, 0.0  ;;  %v839_v43 = vmul.f32 %v1317_v27, %v830_v41 }
 0x250   : > { %v857_v47 = vrot.slane %v850_v42, 4  ;;  %v866_v48 = vrot.slane %v850_v42, 6  ;;  %1519 = vmatprep.mubr.f32.mxu1 %v850_v42  ;;  %v848_v49 = vadd.f32 %v1318_v29, %v839_v43 }
 0x252   : > { %v858_v40 = vsel %vm855_vm3, %v856_v44, %v857_v47  ;;  %v867_v51 = vsel %vm516_vm2, %v865_v45, %v866_v48  ;;  %v851_v46 = vmax.f32 %v848_v49, 0.0 }
 0x253   : > { %863 = vst [vmem:[#allocation3] sm:$0xff] %v858_v40  ;;  %872 = vst [vmem:[#allocation3 + $0x8] sm:$0xff] %v867_v51 }
 0x254   : > { %879 = vst [vmem:[#allocation3] sm:$0xf] %v1966_v1  ;;  %880 = vst [vmem:[#allocation3 + $0x8] sm:$0x3] %v1966_v1  ;;  %v859_v52 = vrot.slane %v851_v46, 4  ;;  %v868_v53 = vrot.slane %v851_v46, 6  ;;  %1520 = vmatmul.mubr.f32.vlgmr.msra.gmra.mrb[6].mxu1 %v851_v46 }
 0x255   : > { %v1319_v1 = vld [vmem:[%s2435_s8] ss:$0 sm:$0xff] }
 0x256   : > { %v860_v54 = vsel %vm855_vm3, %v857_v47, %v859_v52  ;;  %v869_v55 = vsel %vm516_vm2, %v866_v48, %v868_v53 }
 0x25b   : > { %v882_v56 = vld [vmem:[#allocation3 + $0x8] sm:$0xff]  ;;  %v881_v57 = vld [vmem:[#allocation3] sm:$0xff] }
 0x25c   : > { %1006 = vmatprep.mubr.f32.mxu0 %v882_v56 }
 0x25d   : > { %1007 = vmatmul.mubr.f32.vlgmr.msra.gmra.mrb[6].mxu0 %v881_v57 }
 0x25e   : > { %1011 = vmatprep.mubr.f32.mxu0 %v869_v55 }
 0x261   : > { %1012 = vmatmul.mubr.f32.gmra.mrb[8].mxu0 %v860_v54 }
 0x327   : > { %v1521_v59 = vpop.f32.mrb[6].mxu1 }
 0x328   : > { %v1083_v60 = vpop.f32.mrb[7].mxu1 }
 0x330   : > { %v1422_v61 = vpop.f32.mrb[6].mxu0 }
 0x331   : > { %v1423_v62 = vpop.f32.mrb[7].mxu0 }
 0x332   : > { %v1424_v63 = vadd.f32 %v1423_v62, %v1422_v61 }
 0x334   : > { %v1009_v2 = vadd.f32 %v1424_v63, %v1319_v1  ;;  %v1425_v3 = vpop.f32.mrb[8].mxu0 }
 0x335   : > { %v1426_v4 = vpop.f32.mrb[9].mxu0 }
 0x336   : > { %v1427_v5 = vadd.f32 %v1426_v4, %v1425_v3  ;;  %v1084_v6 = vadd.f32 %v1083_v60, %v1009_v2 }
 0x338   : > { %v1014_v7 = vadd.f32 %v1427_v5, %v1319_v1  ;;  %1094 = vadd.xlane.f32.xlu0 %v1084_v6  ;;  %v1098_v8 = vmul.f32 %v1084_v6, %v1084_v6 }
 0x33a   : > { %v1089_v9 = vadd.f32 %v1521_v59, %v1014_v7 }
 0x33c   : > { %1100 = vadd.xlane.f32.xlu0 %v1098_v8  ;;  %1096 = vadd.xlane.f32.xlu1 %v1089_v9  ;;  %v1099_v10 = vmul.f32 %v1089_v9, %v1089_v9 }
 0x340   : > { %1102 = vadd.xlane.f32.xlu1 %v1099_v10 }
 0x3c5   : > { %v1095_v11 = vpop.xlane.xlu0 %1094 }
 0x3c6   : > { %v1104_v12 = vmul.f32 0.03125, %v1095_v11 }
 0x3c8   : > { %v1108_v15 = vmul.f32 %v1104_v12, %v1104_v12  ;;  %v1114_v26 = vsub.f32 %v1084_v6, %v1104_v12 }
 0x3c9   : > { %v1101_v13 = vpop.xlane.xlu0 %1100  ;;  %v1097_v14 = vpop.xlane.xlu1 %1096 }
 0x3ca   : > { %v1106_v16 = vmul.f32 0.03125, %v1101_v13  ;;  %v1105_v17 = vmul.f32 0.03125, %v1097_v14 }
 0x3cc   : > { %v1110_v18 = vsub.f32 %v1106_v16, %v1108_v15  ;;  %v1109_v21 = vmul.f32 %v1105_v17, %v1105_v17  ;;  %v1115_v33 = vsub.f32 %v1089_v9, %v1105_v17 }
 0x3cd   : > { %v1103_v19 = vpop.xlane.xlu1 %1102 }
 0x3ce   : > { %v1112_v20 = vmax.f32 %v1110_v18, 0.0  ;;  %v1107_v22 = vmul.f32 0.03125, %v1103_v19 }
 0x3d0   : > { %v1116_v23 = vadd.f32 1e-08, %v1112_v20  ;;  %v1111_v0 = vsub.f32 %v1107_v22, %v1109_v21 }
 0x3d2   : > { %1743 = vrsqrt.f32 %v1116_v23  ;;  %v1113_v24 = vmax.f32 %v1111_v0, 0.0 }
 0x3d4   : > { %v1117_v25 = vadd.f32 1e-08, %v1113_v24 }
 0x3d6   : > { %1745 = vrsqrt.f32 %v1117_v25 }
 0x3dc   : > { %v1744_v27 = vpop.eup %1743 }
 0x3dd   : > { %v1120_v29 = vmul.f32 %v1744_v27, %v1114_v26 }
 0x3df   : > { %v1128_v31 = vmul.f32 %v1320_v28, %v1120_v29 }
 0x3e0   : > { %v1746_v34 = vpop.eup %1745 }
 0x3e1   : > { %v1136_v35 = vadd.f32 %v1321_v30, %v1128_v31  ;;  %v1121_v36 = vmul.f32 %v1746_v34, %v1115_v33 }
 0x3e3   : > { %v1138_v37 = vmax.f32 %v1136_v35, 0.0  ;;  %v1129_v38 = vmul.f32 %v1320_v28, %v1121_v36 }
 0x3e5   : > { %v1142_v39 = vmul.f32 %v1141_v32, %v1138_v37  ;;  %v1137_v41 = vadd.f32 %v1321_v30, %v1129_v38 }
 0x3e7   : > { %v1139_v42 = vmax.f32 %v1137_v41, 0.0  ;;  %v1146_v43 = vadd.f32 %v1142_v39, %v2303_v50 }
 0x3e9   : > { %v1143_v44 = vmul.f32 %v1141_v32, %v1139_v42  ;;  %1148 = vst [vmem:[%s505_s25] sm:$0xff] %v1146_v43 }
 0x3eb   : > { %v1147_v45 = vadd.f32 %v1143_v44, %v2310_v58 }
 0x3ed   : > { %1149 = vst [vmem:[%s505_s25 + $0x8] sm:$0xff] %v1147_v45 }
 0x3ee   : > { %1876 = shalt.err (!%p1873_p7)
}
 0x3ef   : > { %s1877_s12 = scalar_lea.hbm %s2375_s26, 256  ;;  %s1881_s7 = scalar_lea.hbm %s2481_s0, 512 }
 0x3f0   : > { %p1878_p12 = scmp.ne.s32.totalorder %s2375_s26, %s1877_s12  ;;  %p1882_p11 = scmp.lt.u32.totalorder %s2375_s26, %s2481_s0 }
 0x3f1   : > { %p1883_p13 = scmp.lt.u32.totalorder %s1881_s7, %s1877_s12  ;;  %p1885_p2 = scmp.lt.u32.totalorder %s1877_s12, %s2375_s26 }
 0x3f2   : > { %p1879_p1 = pnand %p1878_p12, %p2482_p6 }
 0x3f3   : > { %p1884_p0 = por %p1883_p13, %p1882_p11 }
 0x3f4   : > { %p1880_p8 = pneg %p1879_p1 }
 0x3f5   : > { %p1886_p10 = por %p1885_p2, %p1884_p0 }
 0x3f7   : > { %p1887_p3 = pnand %p1886_p10, %p1880_p8 }
 0x3f9   : > { %1890 = shalt.err (!%p1887_p3)
}
 0x3fa   : > { %s1969_s27 = smov 128   ;;  %s1970_s14 = smov 8  }
 0x3fb   : > { %1654 = dma.vmem_to_hbm [thread:$0]  (%p2482_p6), %s2377_s17, 256, %s2375_s26, %s1151_s3, %s1969_s27, %s1969_s27, %s1970_s14  }
 0x3fc PF: > { %s2483_s10 = sld [smem:[#allocation19_spill]]  ;;  %s2484_s1 = sld [smem:[#allocation22_spill]] }
 0x3fd   : > { %p2486_p9 = scmp.ge.s32.totalorder %s1957_s24, 2 }
 0x402   : > { %s1181_s25 = sand.u32 1, %s2483_s10   ;;  %p2485_p4 = scmp.ne.s32.totalorder %s2484_s1, 0 }
 0x403   : > { %s1182_s28 = scalar_lea.sflag [#allocation7], %s1181_s25 }
 0x404   : > { %p1671_p5 = pnand %p2486_p9, %p2485_p4 }
 0x406   : > { %1932 = dma.done.wait (!%p1671_p5), %s1182_s28, 256  }
 0x407   : > { %1934 = vsyncadd (!%p1671_p5), %s1182_s28, 4294967040  ;;  %s32_s24 = sadd.s32 1, %s1957_s24   ;;  %s2487_s13 = sld [smem:[#allocation20_spill]] }
 0x408   : > { %p29_p7 = scmp.ge.s32.totalorder %s32_s24, 4   ;;  %s2488_s21 = sld [smem:[#allocation24_spill]] }
 0x409   : > { %s2489_s22 = sld [smem:[#allocation21_spill]]  ;;  %s2490_s23 = sld [smem:[#allocation23_spill]] }
 0x40a   : > { %s2491_s19 = smov %s1941_s20  ;;  %31 = sbr.rel (!%p29_p7) target bundleno = 16 (0x10), region = 142 }
 0x40d   : > { %s2492_s20 = smov %s2487_s13 }
 0x411   :  { %1187 = vsyncpa [#allocation6], 1 }
 0x412   :  { %1189 = vsyncpa [#allocation6 + $0x1], 1 }
 0x413   :  { %1190 = vsyncpa [#allocation9], 1 }
 0x414   :  { %1192 = vsyncpa [#allocation9 + $0x1], 1 }
 0x415   :  { %1193 = vsyncpa [#allocation12], 1 }
 0x416   :  { %1194 = vsyncpa [#allocation7], 1 }
 0x417   :  { %1196 = vsyncpa [#allocation7 + $0x1], 1 }

// kernel: tpu_custom_call.1
= control target key start
LH: loop header
LB: loop body
LE: loop exit
PB: predicated region body
PF: predicated region fallthrough
CT: control target
= control target key end

     0   :  { %s2427_s0 = inlined_call_operand.<no memory space> [shape: f32[1], index: 0, kind: input, shape index: {}]   ;;  %s2428_s1 = inlined_call_operand.hbm [shape: f32[2,16,128], index: 1, kind: input, shape index: {}]   ;;  %s2429_s2 = inlined_call_operand.hbm [shape: f32[2,16,128], index: 2, kind: input, shape index: {}]   ;;  %s2430_s3 = inlined_call_operand.hbm [shape: f32[384,128], index: 3, kind: input, shape index: {}]   ;;  %s2431_s4 = inlined_call_operand.vmem [shape: f32[1,128], index: 4, kind: input, shape index: {}]   ;;  %s2432_s5 = inlined_call_operand.vmem [shape: f32[1,128], index: 5, kind: input, shape index: {}]   ;;  %s2433_s6 = inlined_call_operand.vmem [shape: f32[1,128], index: 6, kind: input, shape index: {}]   ;;  %s2434_s7 = inlined_call_operand.hbm [shape: f32[384,128], index: 7, kind: input, shape index: {}]   ;;  %s2435_s8 = inlined_call_operand.vmem [shape: f32[1,128], index: 8, kind: input, shape index: {}]   ;;  %s2436_s9 = inlined_call_operand.vmem [shape: f32[1,128], index: 9, kind: input, shape index: {}]   ;;  %s2437_s10 = inlined_call_operand.vmem [shape: f32[1,128], index: 10, kind: input, shape index: {}]   ;;  %s2438_s11 = inlined_call_operand.hbm [shape: f32[2,16,128], index: 11, kind: output, shape index: {}]  }
   0x1   :  { %2452 = sst [smem:[#allocation25_spill]] %s2428_s1 }
   0x2   :  { %2453 = sst [smem:[#allocation26_spill]] %s2430_s3 }
   0x3   :  { %2454 = sst [smem:[#allocation27_spill]] %s2434_s7 }
   0x4   :  { %2455 = sst [smem:[#allocation28_spill]] %s2437_s10 }
   0x5   :  { %2456 = sst [smem:[#allocation29_spill]] %s2438_s11 }
   0x6   :  { %16 = sst [smem:[#allocation4]] %s2427_s0 }
   0x7   :  { %17 = vsyncpa [#allocation6], 0 }
   0x8   :  { %19 = vsyncpa [#allocation6 + $0x1], 0 }
   0x9   :  { %20 = vsyncpa [#allocation9], 0 }
   0xa   :  { %22 = vsyncpa [#allocation9 + $0x1], 0 }
   0xb   :  { %23 = vsyncpa [#allocation12], 0 }
   0xc   :  { %24 = vsyncpa [#allocation7], 0 }
   0xd   :  { %26 = vsyncpa [#allocation7 + $0x1], 0  ;;  %s2034_s19 = smov 0   ;;  %s2036_s20 = smov 0  }
   0xe   :  { %s2038_s21 = smov 0   ;;  %s2040_s22 = smov 0  }
   0xf   :  { %s2042_s23 = smov 0   ;;  %s2044_s24 = smov 0  }
  0x10 LB: > { %2457 = sst [smem:[#allocation19_spill]] %s1937_s19  ;;  %s2065_s0 = sadd.s32 4294967295, %s1957_s24   ;;  %s1957_s24 = sphi %s2044_s24, %s32_s24   ;;  %s1953_s23 = sphi %s2042_s23, %s2490_s23   ;;  %s1949_s22 = sphi %s2040_s22, %s2489_s22   ;;  %s1945_s21 = sphi %s2038_s21, %s2488_s21   ;;  %s1941_s20 = sphi %s2036_s20, %s2492_s20   ;;  %s1937_s19 = sphi %s2034_s19, %s2491_s19  }
  0x11   : > { %2458 = sst [smem:[#allocation20_spill]] %s1945_s21  ;;  %s1299_s25 = sadd.s32 4294967294, %s1957_s24  }
  0x12   : > { %2459 = sst [smem:[#allocation21_spill]] %s1953_s23  ;;  %p87_p0 = scmp.ne.s32.totalorder %s1941_s20, %s1937_s19 }
  0x13   : > { %p2440_p1 = scmp.eq.s32.totalorder %s2065_s0, 0  ;;  %p321_p3 = scmp.eq.s32.totalorder %s1299_s25, 1 }
  0x14   : > { %p1300_p5 = scmp.ge.s32.totalorder %s1957_s24, 1  ;;  %p328_p7 = scmp.lt.s32.totalorder %s1957_s24, 3 }
  0x15   : > { %p2074_p4 = por %p2440_p1, %p87_p0  ;;  %p2079_p6 = por %p321_p3, %p87_p0 }
  0x16   : > { %p2084_p8 = pnand %p1300_p5, %p328_p7  ;;  %s1959_s29 = smov [#allocation10]  }
  0x17   : > { %s2460_s26 = scalar_select %p2074_p4, 1, 0 }
  0x18   : > { %s2461_s27 = scalar_select %p2079_p6, 1, 0 }
  0x19   : > { %s343_s30 = sshll.u32 %s1959_s29, 4  ;;  %p1656_p9 = pneg %p2084_p8  ;;  %s2088_s30 = int_to_ptr.vmem [resolvable:$true] %s343_s30 }
  0x1a   : > { %2462 = sst [smem:[#allocation22_spill]] %s2461_s27  ;;  %s1960_s13 = smov [#allocation11]  }
  0x1b   : > { %p2095_p11 = pnand %p1656_p9, %p2440_p1  ;;  %s365_s14 = sshll.u32 %s1960_s13, 4  ;;  %s2099_s14 = int_to_ptr.vmem [resolvable:$true] %s365_s14 }
  0x1c   : > { %s2465_s3 = sld [smem:[#allocation26_spill]] }
  0x1d   : > { %p1749_p13 = pneg %p2095_p11 }
  0x22   : > { %s1747_s17 = scalar_lea.hbm %s2465_s3, 6144 }
  0x23   : > { %p1748_p12 = scmp.ne.s32.totalorder %s2465_s3, %s1747_s17  ;;  %p1754_p5 = scmp.lt.u32.totalorder %s1747_s17, %s2465_s3 }
  0x25   : > { %p1750_p0 = pnand %p1749_p13, %p1748_p12 }
  0x27   : > { %p1751_p3 = pneg %p1750_p0 }
  0x29   : > { %p1756_p7 = pnand %p1754_p5, %p1751_p3 }
  0x2b   : > { %1759 = shalt.err (!%p1756_p7)
}
  0x2c   : > { %s1760_s13 = scalar_lea.vmem %s2088_s30, 6144  ;;  %p1768_p2 = scmp.lt.s32.totalorder %s2088_s30, %s2088_s30 }
  0x2d   : > { %p1761_p9 = scmp.ne.s32.totalorder %s2088_s30, %s1760_s13  ;;  %p1769_p12 = scmp.lt.s32.totalorder %s1760_s13, %s1760_s13 }
  0x2f   : > { %p1763_p10 = pnand %p1761_p9, %p1749_p13  ;;  %p1770_p0 = por %p1769_p12, %p1768_p2 }
  0x31   : > { %p1764_p1 = pneg %p1763_p10 }
  0x33   : > { %p1771_p6 = pnand %p1770_p0, %p1764_p1 }
  0x35   : > { %1774 = shalt.err (!%p1771_p6)
}
  0x36   : > { %s2443_s27 = smov 128   ;;  %s2445_s15 = smov 8  }
  0x37   : > { %1659 = dma.hbm_to_vmem [thread:$0]  (!%p2095_p11), %s2465_s3, 6144, %s2088_s30, [#allocation9], %s2443_s27, %s2443_s27, %s2445_s15  }
  0x38   : > { %s2466_s7 = sld [smem:[#allocation27_spill]] }
  0x3e   : > { %s1775_s29 = scalar_lea.hbm %s2466_s7, 6144 }
  0x3f   : > { %p1776_p1 = scmp.ne.s32.totalorder %s2466_s7, %s1775_s29  ;;  %p1782_p10 = scmp.lt.u32.totalorder %s1775_s29, %s2466_s7 }
  0x41   : > { %p1778_p2 = pnand %p1776_p1, %p1749_p13 }
  0x43   : > { %p1779_p6 = pneg %p1778_p2 }
  0x45   : > { %p1784_p3 = pnand %p1782_p10, %p1779_p6 }
  0x47   : > { %1787 = shalt.err (!%p1784_p3)
}
  0x48   : > { %s1788_s30 = scalar_lea.vmem %s2099_s14, 6144  ;;  %p1796_p12 = scmp.lt.s32.totalorder %s2099_s14, %s2099_s14 }
  0x49   : > { %p1789_p5 = scmp.ne.s32.totalorder %s2099_s14, %s1788_s30  ;;  %p1797_p0 = scmp.lt.s32.totalorder %s1788_s30, %s1788_s30 }
  0x4b   : > { %p1791_p7 = pnand %p1789_p5, %p1749_p13  ;;  %p1798_p1 = por %p1797_p0, %p1796_p12 }
  0x4d   : > { %p1792_p9 = pneg %p1791_p7 }
  0x4f   : > { %p1799_p2 = pnand %p1798_p1, %p1792_p9 }
  0x51   : > { %1802 = shalt.err (!%p1799_p2)
}
  0x52   : > { %1662 = dma.hbm_to_vmem [thread:$0]  (!%p2095_p11), %s2466_s7, 6144, %s2099_s14, [#allocation12], %s2443_s27, %s2443_s27, %s2445_s15  }
  0x53   : > { %s44_s19 = sadd.s32 1, %s1953_s23  ;;  %s74_s12 = sadd.s32 1, %s1945_s21 }
  0x54   : > { %p46_p13 = scmp.ge.s32.totalorder %s44_s19, 2  ;;  %p81_p6 = scmp.ne.s32.totalorder %s1945_s21, %s1941_s20 }
  0x55   : > { %p82_p10 = scmp.eq.s32.totalorder %s1957_s24, 0  ;;  %p1676_p3 = scmp.lt.s32.totalorder %s1957_s24, 2 }
  0x56   : > { %s2494_s19 = smov (%p46_p13, %s44_s19), 0  ;;  %p2468_p7 = scmp.eq.s32.totalorder %s2065_s0, 1 }
  0x57   : > { %2467 = sst [smem:[#allocation23_spill]] %s2494_s19  ;;  %p83_p5 = por %p82_p10, %p81_p6 }
  0x58   : > { %p2169_p9 = por %p2468_p7, %p81_p6  ;;  %s69_s17 = ssub.s32 %s1953_s23, %s2494_s19 }
  0x59   : > { %s388_s18 = sand.u32 1, %s1945_s21   ;;  %p72_p12 = scmp.eq.s32.totalorder %s69_s17, 0 }
  0x5a   : > { %s2469_s16 = scalar_select %p2169_p9, 1, 0 }
  0x5b   : > { %s2176_s14 = sshll.u32 %s388_s18, 4  ;;  %s1327_s25 = sshll.u32 %s1953_s23, 8 }
  0x5c   : > { %s2180_s29 = scalar_select %p72_p12, %s1945_s21, %s74_s12  }
  0x5d   : > { %s2471_s1 = sld [smem:[#allocation25_spill]]  ;;  %s392_s11 = scalar_lea.vmem [#allocation5], %s2176_s14 }
  0x5e   : > { %2470 = sst [smem:[#allocation24_spill]] %s2180_s29  ;;  %s401_s27 = sshll.u32 %s392_s11, 4  ;;  %s2194_s27 = int_to_ptr.vmem [resolvable:$true] %s401_s27 }
  0x5f   : > { %p2190_p11 = pnand %p1676_p3, %p83_p5  ;;  %s2199_s13 = scalar_lea.hbm %s2429_s2, %s1327_s25 }
  0x60   : > { %s2201_s30 = scalar_lea.sflag [#allocation6], %s388_s18 }
  0x61   : > { %p1805_p1 = pneg %p2190_p11 }
  0x63   : > { %s2185_s10 = scalar_lea.hbm %s2471_s1, %s1327_s25  ;;  %s1808_s19 = scalar_lea.hbm %s2471_s1, 512 }
  0x64   : > { %s1803_s3 = scalar_lea.hbm %s2185_s10, 256  ;;  %p1809_p6 = scmp.lt.u32.totalorder %s2185_s10, %s2471_s1 }
  0x65   : > { %p1804_p0 = scmp.ne.s32.totalorder %s2185_s10, %s1803_s3  ;;  %p1810_p10 = scmp.lt.u32.totalorder %s1808_s19, %s1803_s3 }
  0x66   : > { %p1812_p5 = scmp.lt.u32.totalorder %s1803_s3, %s2185_s10 }
  0x67   : > { %p1806_p2 = pnand %p1805_p1, %p1804_p0  ;;  %p1811_p3 = por %p1810_p10, %p1809_p6 }
  0x69   : > { %p1807_p13 = pneg %p1806_p2  ;;  %p1813_p7 = por %p1812_p5, %p1811_p3 }
  0x6b   : > { %p1814_p12 = pnand %p1813_p7, %p1807_p13 }
  0x6d   : > { %1817 = shalt.err (!%p1814_p12)
}
  0x6e   : > { %s1818_s15 = scalar_lea.vmem %s2194_s27, 256  ;;  %s1963_s7 = smov [#allocation5]  }
  0x6f   : > { %p1819_p0 = scmp.ne.s32.totalorder %s2194_s27, %s1818_s15  ;;  %s1823_s18 = sshll.u32 %s1963_s7, 4  ;;  %s1824_s18 = int_to_ptr.vmem [resolvable:$false] %s1823_s18 }
  0x70   : > { %s1825_s23 = scalar_lea.vmem %s1824_s18, 512  ;;  %p1826_p4 = scmp.lt.s32.totalorder %s2194_s27, %s1824_s18 }
  0x71   : > { %p1821_p2 = pnand %p1819_p0, %p1805_p1  ;;  %p1827_p6 = scmp.lt.s32.totalorder %s1825_s23, %s1818_s15 }
  0x73   : > { %p1822_p9 = pneg %p1821_p2  ;;  %p1828_p10 = por %p1827_p6, %p1826_p4 }
  0x75   : > { %p1829_p3 = pnand %p1828_p10, %p1822_p9 }
  0x77   : > { %1832 = shalt.err (!%p1829_p3)
}
  0x78   : > { %s2473_s3 = smov 8   ;;  %s2474_s19 = smov 128  }
  0x79   : > { %1666 = dma.hbm_to_vmem [thread:$0]  (!%p2190_p11), %s2185_s10, 256, %s2194_s27, %s2201_s30, %s2474_s19, %s2474_s19, %s2473_s3  }
  0x7a   : > { %s415_s25 = scalar_lea.vmem [#allocation8], %s2176_s14  ;;  %s411_s12 = sand.u32 1, %s1957_s24  }
  0x7b   : > { %s427_s29 = sshll.u32 %s415_s25, 4  ;;  %s2236_s11 = scalar_lea.sflag [#allocation9], %s411_s12  ;;  %s2234_s29 = int_to_ptr.vmem [resolvable:$true] %s427_s29 }
  0x7c   : > { %s1833_s15 = scalar_lea.hbm %s2199_s13, 256  ;;  %s1838_s23 = scalar_lea.hbm %s2429_s2, 512 }
  0x7d   : > { %p1834_p4 = scmp.ne.s32.totalorder %s2199_s13, %s1833_s15  ;;  %p1839_p5 = scmp.lt.u32.totalorder %s2199_s13, %s2429_s2 }
  0x7e   : > { %p1840_p7 = scmp.lt.u32.totalorder %s1838_s23, %s1833_s15  ;;  %p1842_p0 = scmp.lt.u32.totalorder %s1833_s15, %s2199_s13 }
  0x7f   : > { %p1836_p9 = pnand %p1834_p4, %p1805_p1 }
  0x80   : > { %p1841_p12 = por %p1840_p7, %p1839_p5 }
  0x81   : > { %p1837_p13 = pneg %p1836_p9 }
  0x82   : > { %p1843_p2 = por %p1842_p0, %p1841_p12 }
  0x84   : > { %p1844_p6 = pnand %p1843_p2, %p1837_p13 }
  0x86   : > { %1847 = shalt.err (!%p1844_p6)
}
  0x87   : > { %s1848_s27 = scalar_lea.vmem %s2234_s29, 256  ;;  %s1964_s14 = smov [#allocation8]  }
  0x88   : > { %p1849_p10 = scmp.ne.s32.totalorder %s2234_s29, %s1848_s27  ;;  %s1853_s10 = sshll.u32 %s1964_s14, 4  ;;  %s1854_s10 = int_to_ptr.vmem [resolvable:$false] %s1853_s10 }
  0x89   : > { %s1855_s1 = scalar_lea.vmem %s1854_s10, 512  ;;  %p1856_p9 = scmp.lt.s32.totalorder %s2234_s29, %s1854_s10 }
  0x8a   : > { %p1851_p3 = pnand %p1849_p10, %p1805_p1  ;;  %p1857_p5 = scmp.lt.s32.totalorder %s1855_s1, %s1848_s27 }
  0x8c   : > { %p1852_p4 = pneg %p1851_p3  ;;  %p1858_p7 = por %p1857_p5, %p1856_p9 }
  0x8e   : > { %p1859_p12 = pnand %p1858_p7, %p1852_p4 }
  0x90   : > { %1862 = shalt.err (!%p1859_p12)
}
  0x91   : > { %1669 = dma.hbm_to_vmem [thread:$0]  (!%p2190_p11), %s2199_s13, 256, %s2234_s29, %s2236_s11, %s2474_s19, %s2474_s19, %s2473_s3  }
  0x92   : > { %439 = sbr.rel (%p2084_p8) target bundleno = 1020 (0x3fc), region = 64  ;;  %s2268_s21 = sand.u32 (!%p2084_p8), 1, %s1941_s20  }
  0x93   : > { %s1311_s30 = sshll.u32 (!%p2084_p8), %s2268_s21, 4  ;;  %s442_s25 = scalar_lea.sflag (!%p2084_p8), [#allocation6], %s2268_s21 }
  0x94   : > { %s2274_s17 = scalar_lea.vmem (!%p2084_p8), [#allocation5], %s1311_s30  ;;  %p2475_p1 = scmp.ne.s32.totalorder (!%p2084_p8), %s2460_s26, 0 }
  0x99   : > { %1916 = dma.done.wait (%p2475_p1), %s442_s25, 256  }
  0x9a   : > { %1918 = vsyncadd (%p2475_p1), %s442_s25, 4294967040  ;;  %s450_s28 = sand.u32 1, %s2065_s0  }
  0x9b   : > { %s451_s13 = scalar_lea.sflag [#allocation9], %s450_s28 }
  0x9c   : > { %1920 = dma.done.wait (%p2475_p1), %s451_s13, 256  }
  0x9d   : > { %1922 = vsyncadd (%p2475_p1), %s451_s13, 4294967040  ;;  %p2476_p8 = scmp.eq.s32.totalorder %s2065_s0, 0 }
  0x9f   : > { %1924 = dma.done.wait (%p2476_p8), [#allocation9], 6144   ;;  %p2477_p11 = pmov %p2476_p8 }
  0xa0   : > { %p2478_p13 = pmov %p2476_p8 }
  0xa1   : > { %1926 = vsyncadd (%p2477_p11), [#allocation9], 4294961152 }
  0xa2   : > { %1928 = dma.done.wait (%p2478_p13), [#allocation12], 6144   ;;  %p2479_p0 = pmov %p2476_p8 }
  0xa3   : > { %v1965_v0 = vmov 0.0|0.0   ;;  %v1966_v1 = vmov 0.0   ;;  %vm1967_vm0 = vmmov 0   ;;  %v588_v2 = vld [vmem:[#allocation10 + $0x80] sm:$0xff]  ;;  %v589_v3 = vld [vmem:[#allocation10 + $0x88] sm:$0xff]  ;;  %v590_v7 = vld [vmem:[#allocation10 + $0x90] sm:$0xff] }
  0xa4   : > { %1930 = vsyncadd (%p2479_p0), [#allocation12], 4294961152  ;;  %1554 = vmatprep.subr.bf16.mxu1 %v1965_v0  ;;  %691 = vmatprep.mubr.f32.mxu0 %v1966_v1  ;;  %559 = vst [vmem:[#allocation2 + $0x18] sm:$0x3] %v1966_v1  ;;  %v572_v4 = vld [vmem:[#allocation10] sm:$0xff]  ;;  %v1522_v5 = vpack.c.bf16 %v589_v3, %v588_v2  ;;  %v573_v6 = vld [vmem:[#allocation10 + $0x8] sm:$0xff] }
  0xa5   : > { %561 = vst [vmem:[#allocation2 + $0x20] sm:$0x1] %v1966_v1  ;;  %1478 = vmatprep.mubr.msk.f32.mxu1 %vm1967_vm0, %v1966_v1  ;;  %v591_v8 = vld [vmem:[#allocation10 + $0x98] sm:$0xff]  ;;  %v1524_v9 = vpack.c.bf16 %v573_v6, %v572_v4  ;;  %v574_v11 = vld [vmem:[#allocation10 + $0x10] sm:$0xff]  ;;  %v604_v13 = vld [vmem:[#allocation10 + $0x100] sm:$0xff]  ;;  %vm528_vm1 = vcmask 1040384  }
  0xa6   : > { %v1526_v10 = vpack.c.bf16 %v591_v8, %v590_v7  ;;  %v575_v12 = vld [vmem:[#allocation10 + $0x18] sm:$0xff]  ;;  %1523 = vmatprep.subr.bf16.mxu0 %v1522_v5  ;;  %v605_v14 = vld [vmem:[#allocation10 + $0x108] sm:$0xff]  ;;  %v592_v15 = vld [vmem:[#allocation10 + $0xa0] sm:$0xff]  ;;  %vm516_vm2 = vcmask 1041408   ;;  %vm855_vm3 = vcmask 1043456   ;;  %s1140_s7 = sld [smem:[#allocation4]] }
  0xa7   : > { %v593_v16 = vld [vmem:[#allocation10 + $0xa8] sm:$0xff]  ;;  %1525 = vmatpush3.bf16.msra.mxu0 %v1524_v9  ;;  %v1528_v17 = vpack.c.bf16 %v575_v12, %v574_v11  ;;  %v1555_v18 = vpack.c.bf16 %v605_v14, %v604_v13  ;;  %v606_v19 = vld [vmem:[#allocation10 + $0x110] sm:$0xff]  ;;  %v576_v21 = vld [vmem:[#allocation10 + $0x20] sm:$0xff]  ;;  %s2480_s10 = sld [smem:[#allocation28_spill]]  ;;  %s1329_s1 = sshll.u32 %s1949_s22, 8 }
  0xa8   : > { %1527 = vmatprep.subr.bf16.mxu0 %v1526_v10  ;;  %v1530_v20 = vpack.c.bf16 %v593_v16, %v592_v15  ;;  %v577_v22 = vld [vmem:[#allocation10 + $0x28] sm:$0xff]  ;;  %v607_v23 = vld [vmem:[#allocation10 + $0x118] sm:$0xff]  ;;  %v594_v25 = vld [vmem:[#allocation10 + $0xb0] sm:$0xff]  ;;  %s505_s25 = scalar_lea.vmem [#allocation13], %s1311_s30  ;;  %s2481_s0 = sld [smem:[#allocation29_spill]] }
  0xa9   : > { %1556 = vmatpush3.bf16.msra.mxu1 %v1555_v18  ;;  %v1558_v24 = vpack.c.bf16 %v607_v23, %v606_v19  ;;  %v595_v26 = vld [vmem:[#allocation10 + $0xb8] sm:$0xff]  ;;  %v608_v27 = vld [vmem:[#allocation10 + $0x120] sm:$0xff]  ;;  %v609_v28 = vld [vmem:[#allocation10 + $0x128] sm:$0xff]  ;;  %v1532_v29 = vpack.c.bf16 %v577_v22, %v576_v21  ;;  %s1151_s3 = scalar_lea.sflag [#allocation7], %s2268_s21  ;;  %p2482_p6 = scmp.ne.s32.totalorder %s2469_s16, 0 }
  0xaa   : > { %1557 = vmatprep.subr.bf16.mxu1 %v1965_v0  ;;  %v1534_v30 = vpack.c.bf16 %v595_v26, %v594_v25  ;;  %v578_v31 = vld [vmem:[#allocation10 + $0x30] sm:$0xff]  ;;  %v579_v32 = vld [vmem:[#allocation10 + $0x38] sm:$0xff]  ;;  %v1561_v33 = vpack.c.bf16 %v609_v28, %v608_v27  ;;  %v596_v34 = vld [vmem:[#allocation10 + $0xc0] sm:$0xff]  ;;  %s1968_s30 = smov [#allocation13]  }
  0xab   : > { %1529 = vmatpush3.bf16.msra.mxu0 %v1528_v17  ;;  %v597_v35 = vld [vmem:[#allocation10 + $0xc8] sm:$0xff]  ;;  %v610_v36 = vld [vmem:[#allocation10 + $0x130] sm:$0xff]  ;;  %v611_v37 = vld [vmem:[#allocation10 + $0x138] sm:$0xff]  ;;  %v1536_v38 = vpack.c.bf16 %v579_v32, %v578_v31  ;;  %s1867_s19 = sshll.u32 %s1968_s30, 4  ;;  %s1868_s19 = int_to_ptr.vmem [resolvable:$false] %s1867_s19 }
  0xac   : > { %1531 = vmatprep.subr.bf16.mxu0 %v1530_v20  ;;  %v580_v39 = vld [vmem:[#allocation10 + $0x40] sm:$0xff]  ;;  %v1538_v40 = vpack.c.bf16 %v597_v35, %v596_v34  ;;  %v581_v41 = vld [vmem:[#allocation10 + $0x48] sm:$0xff]  ;;  %v598_v42 = vld [vmem:[#allocation10 + $0xd0] sm:$0xff]  ;;  %v1564_v44 = vpack.c.bf16 %v611_v37, %v610_v36  ;;  %s1869_s29 = scalar_lea.vmem %s1868_s19, 512 }
  0xad   : > { %1559 = vmatpush3.bf16.msra.mxu1 %v1558_v24  ;;  %v599_v43 = vld [vmem:[#allocation10 + $0xd8] sm:$0xff]  ;;  %v582_v45 = vld [vmem:[#allocation10 + $0x50] sm:$0xff]  ;;  %v612_v46 = vld [vmem:[#allocation10 + $0x140] sm:$0xff]  ;;  %v1540_v48 = vpack.c.bf16 %v581_v41, %v580_v39 }
  0xae   : > { %1560 = vmatprep.subr.bf16.mxu1 %v1965_v0  ;;  %v613_v47 = vld [vmem:[#allocation10 + $0x148] sm:$0xff]  ;;  %v1542_v49 = vpack.c.bf16 %v599_v43, %v598_v42  ;;  %v2303_v50 = vld [vmem:[%s2274_s17] sm:$0xff]  ;;  %v583_v53 = vld [vmem:[#allocation10 + $0x58] sm:$0xff]  ;;  %s2375_s26 = scalar_lea.hbm %s2481_s0, %s1329_s1 }
  0xaf   : > { %1533 = vmatpush3.bf16.msra.mxu0 %v1532_v29  ;;  %v525_v51 = vld [vmem:[%s2274_s17 + $0x8] sm:$0x7f]  ;;  %v529_v54 = vrot.slane %v2303_v50, 7  ;;  %v517_v55 = vrot.slane %v2303_v50, 6  ;;  %v1567_v59 = vpack.c.bf16 %v613_v47, %v612_v46  ;;  %v600_v60 = vld [vmem:[#allocation10 + $0xe0] sm:$0xff]  ;;  %v614_v62 = vld [vmem:[#allocation10 + $0x150] sm:$0xff]  ;;  %v1544_v4 = vpack.c.bf16 %v583_v53, %v582_v45 }
  0xb0   : > { %1535 = vmatprep.subr.bf16.mxu0 %v1534_v30  ;;  %v513_v52 = vld [vmem:[%s2274_s17 + $0x8] sm:$0x3f]  ;;  %v530_v56 = vrot.slane %v525_v51, 7  ;;  %v584_v6 = vld [vmem:[#allocation10 + $0x60] sm:$0xff]  ;;  %v602_v9 = vld [vmem:[#allocation10 + $0xf0] sm:$0xff] }
  0xb1   : > { %1562 = vmatpush3.bf16.msra.mxu1 %v1561_v33  ;;  %v518_v57 = vrot.slane %v513_v52, 6  ;;  %v2310_v58 = vld [vmem:[%s2274_s17 + $0x8] sm:$0xff]  ;;  %534 = vst [vmem:[#allocation2 + $0x20] sm:$0xfe] %v529_v54  ;;  %522 = vst [vmem:[#allocation2 + $0x18] sm:$0xfc] %v517_v55 }
  0xb2   : > { %1563 = vmatprep.subr.bf16.mxu1 %v1965_v0  ;;  %v601_v61 = vld [vmem:[#allocation10 + $0xe8] sm:$0xff]  ;;  %v615_v63 = vld [vmem:[#allocation10 + $0x158] sm:$0xff]  ;;  %v531_v2 = vsel %vm528_vm1, %v529_v54, %v530_v56  ;;  %v616_v11 = vld [vmem:[#allocation10 + $0x160] sm:$0xff]  ;;  %s1166_s17 = sshll.u32 %s505_s25, 4  ;;  %s2377_s17 = int_to_ptr.vmem [resolvable:$true] %s1166_s17 }
  0xb3   : > { %1537 = vmatpush3.bf16.msra.mxu0 %v1536_v38  ;;  %v519_v3 = vsel %vm516_vm2, %v517_v55, %v518_v57  ;;  %v1546_v5 = vpack.c.bf16 %v601_v61, %v600_v60  ;;  %v585_v7 = vld [vmem:[#allocation10 + $0x68] sm:$0xff]  ;;  %v1570_v8 = vpack.c.bf16 %v615_v63, %v614_v62  ;;  %v603_v10 = vld [vmem:[#allocation10 + $0xf8] sm:$0xff]  ;;  %v586_v15 = vld [vmem:[#allocation10 + $0x70] sm:$0xff]  ;;  %s1863_s22 = scalar_lea.vmem %s2377_s17, 256  ;;  %p1870_p4 = scmp.lt.s32.totalorder %s2377_s17, %s1868_s19 }
  0xb4   : > { %1539 = vmatprep.subr.bf16.mxu0 %v1538_v40  ;;  %v617_v12 = vld [vmem:[#allocation10 + $0x168] sm:$0xff]  ;;  %v1548_v13 = vpack.c.bf16 %v585_v7, %v584_v6  ;;  %v1550_v14 = vpack.c.bf16 %v603_v10, %v602_v9  ;;  %v587_v16 = vld [vmem:[#allocation10 + $0x78] sm:$0xff]  ;;  %v618_v18 = vld [vmem:[#allocation10 + $0x170] sm:$0xff]  ;;  %p1864_p2 = scmp.ne.s32.totalorder %s2377_s17, %s1863_s22  ;;  %p1871_p9 = scmp.lt.s32.totalorder %s1869_s29, %s1863_s22 }
  0xb5   : > { %1565 = vmatpush3.bf16.msra.mxu1 %v1564_v44  ;;  %v1573_v17 = vpack.c.bf16 %v617_v12, %v616_v11  ;;  %v619_v19 = vld [vmem:[#allocation10 + $0x178] sm:$0xff]  ;;  %v1552_v20 = vpack.c.bf16 %v587_v16, %v586_v15  ;;  %v1316_v25 = vld [vmem:[%s2431_s4] ss:$0 sm:$0xff]  ;;  %v921_v52 = vld [vmem:[#allocation11 + $0x110] sm:$0xff] }
  0xb6   : > { %1566 = vmatprep.subr.bf16.mxu1 %v1965_v0  ;;  %v1576_v21 = vpack.c.bf16 %v619_v19, %v618_v18  ;;  %v922_v53 = vld [vmem:[#allocation11 + $0x118] sm:$0xff]  ;;  %v923_v55 = vld [vmem:[#allocation11 + $0x120] sm:$0xff]  ;;  %v924_v56 = vld [vmem:[#allocation11 + $0x128] sm:$0xff]  ;;  %p1865_p10 = pnand %p1864_p2, %p2482_p6  ;;  %p1872_p5 = por %p1871_p9, %p1870_p4 }
  0xb7   : > { %1541 = vmatpush3.bf16.msra.mxu0 %v1540_v48  ;;  %v919_v48 = vld [vmem:[#allocation11 + $0x100] sm:$0xff]  ;;  %v1614_v54 = vpack.c.bf16 %v922_v53, %v921_v52  ;;  %v1618_v60 = vpack.c.bf16 %v924_v56, %v923_v55  ;;  %v888_v63 = vld [vmem:[#allocation11 + $0x8] sm:$0xff]  ;;  %v906_v6 = vld [vmem:[#allocation11 + $0x98] sm:$0xff] }
  0xb8   : > { %1543 = vmatprep.subr.bf16.mxu0 %v1542_v49  ;;  %v567_v22 = vld [vmem:[#allocation2 + $0x20] sm:$0xff]  ;;  %v566_v23 = vld [vmem:[#allocation2 + $0x18] sm:$0xff]  ;;  %v889_v9 = vld [vmem:[#allocation11 + $0x10] sm:$0xff]  ;;  %p1866_p3 = pneg %p1865_p10 }
  0xb9   : > { %1568 = vmatpush3.bf16.msra.mxu1 %v1567_v59  ;;  %v920_v49 = vld [vmem:[#allocation11 + $0x108] sm:$0xff]  ;;  %v903_v57 = vld [vmem:[#allocation11 + $0x80] sm:$0xff]  ;;  %v890_v10 = vld [vmem:[#allocation11 + $0x18] sm:$0xff] }
  0xba   : > { %1569 = vmatprep.subr.bf16.mxu1 %v1965_v0  ;;  %v1610_v51 = vpack.c.bf16 %v920_v49, %v919_v48  ;;  %v904_v59 = vld [vmem:[#allocation11 + $0x88] sm:$0xff]  ;;  %v887_v62 = vld [vmem:[#allocation11] sm:$0xff]  ;;  %v1584_v11 = vpack.c.bf16 %v890_v10, %v889_v9  ;;  %v898_v48 = vld [vmem:[#allocation11 + $0x58] sm:$0xff]  ;;  %p1873_p7 = pnand %p1872_p5, %p1866_p3 }
  0xbb   : > { %1545 = vmatpush3.bf16.msra.mxu0 %v1544_v4  ;;  %v1578_v61 = vpack.c.bf16 %v904_v59, %v903_v57  ;;  %v926_v4 = vld [vmem:[#allocation11 + $0x138] sm:$0xff]  ;;  %v927_v12 = vld [vmem:[#allocation11 + $0x140] sm:$0xff]  ;;  %v908_v15 = vld [vmem:[#allocation11 + $0xa8] sm:$0xff] }
  0xbc   : > { %1547 = vmatprep.subr.bf16.mxu0 %v1546_v5  ;;  %v905_v5 = vld [vmem:[#allocation11 + $0x90] sm:$0xff]  ;;  %v891_v18 = vld [vmem:[#allocation11 + $0x20] sm:$0xff]  ;;  %v892_v19 = vld [vmem:[#allocation11 + $0x28] sm:$0xff] }
  0xbd   : > { %1571 = vmatpush3.bf16.msra.mxu1 %v1570_v8  ;;  %v1582_v8 = vpack.c.bf16 %v906_v6, %v905_v5  ;;  %v916_v52 = vld [vmem:[#allocation11 + $0xe8] sm:$0xff]  ;;  %v917_v57 = vld [vmem:[#allocation11 + $0xf0] sm:$0xff]  ;;  %v918_v59 = vld [vmem:[#allocation11 + $0xf8] sm:$0xff] }
  0xbe   : > { %1572 = vmatprep.subr.bf16.mxu1 %v1965_v0  ;;  %v900_v55 = vld [vmem:[#allocation11 + $0x68] sm:$0xff] }
  0xbf   : > { %1549 = vmatpush3.bf16.msra.mxu0 %v1548_v13  ;;  %v928_v13 = vld [vmem:[#allocation11 + $0x148] sm:$0xff] }
  0xc0   : > { %1551 = vmatprep.subr.bf16.mxu0 %v1550_v14  ;;  %v907_v14 = vld [vmem:[#allocation11 + $0xa0] sm:$0xff]  ;;  %v1626_v16 = vpack.c.bf16 %v928_v13, %v927_v12 }
  0xc1   : > { %1574 = vmatpush3.bf16.msra.mxu1 %v1573_v17  ;;  %v1586_v17 = vpack.c.bf16 %v908_v15, %v907_v14 }
  0xc2   : > { %1575 = vmatprep.subr.bf16.mxu1 %v1965_v0 }
  0xc3   : > { %1553 = vmatpush3.bf16.msra.mxu0 %v1552_v20  ;;  %v1588_v20 = vpack.c.bf16 %v892_v19, %v891_v18 }
  0xc4   : > { %1579 = vmatprep.subr.bf16.mxu0 %v1578_v61  ;;  %v901_v61 = vld [vmem:[#allocation11 + $0x70] sm:$0xff] }
  0xc5   : > { %1577 = vmatpush3.bf16.msra.mxu1 %v1576_v21  ;;  %v929_v21 = vld [vmem:[#allocation11 + $0x150] sm:$0xff] }
  0xc6   : > { %692 = vmatmul.mubr.f32.vlgmr.msra.gmra.mrb[0].mxu0 %v1966_v1  ;;  %1611 = vmatprep.subr.bf16.mxu1 %v1610_v51 }
  0xc7   : > { %696 = vmatprep.mubr.f32.mxu0 %v567_v22  ;;  %v930_v22 = vld [vmem:[#allocation11 + $0x158] sm:$0xff] }
  0xc8   : > { %1479 = vmatmul.mubr.f32.vlgmr.msra.gmra.mrb[0].mxu1 %v1966_v1 }
  0xc9   : > { %1481 = vmatprep.mubr.msk.f32.mxu1 %vm1967_vm0, %v1966_v1  ;;  %1613 = vmatpush3.bf16.msra.mxu1 %v1610_v51  ;;  %v915_v51 = vld [vmem:[#allocation11 + $0xe0] sm:$0xff] }
  0xca   : > { %697 = vmatmul.mubr.f32.gmra.mrb[2].mxu0 %v566_v23  ;;  %1615 = vmatprep.subr.bf16.mxu1 %v1614_v54  ;;  %v909_v23 = vld [vmem:[#allocation11 + $0xb0] sm:$0xff]  ;;  %v1602_v53 = vpack.c.bf16 %v916_v52, %v915_v51 }
  0xcb   : > { %701 = vmatprep.mubr.f32.mxu0 %v531_v2  ;;  %v1580_v2 = vpack.c.bf16 %v888_v63, %v887_v62  ;;  %v902_v62 = vld [vmem:[#allocation11 + $0x78] sm:$0xff] }
  0xcc   : > { %1482 = vmatmul.mubr.f32.gmra.mrb[2].mxu1 %v2303_v50  ;;  %v1608_v63 = vpack.c.bf16 %v902_v62, %v901_v61 }
  0xcd   : > { %1484 = vmatprep.mubr.msk.f32.mxu1 %vm1967_vm0, %v1966_v1  ;;  %1617 = vmatpush3.bf16.msra.mxu1 %v1614_v54  ;;  %v899_v54 = vld [vmem:[#allocation11 + $0x60] sm:$0xff] }
  0xce   : > { %702 = vmatmul.mubr.f32.gmra.mrb[4].mxu0 %v519_v3  ;;  %1619 = vmatprep.subr.bf16.mxu1 %v1618_v60  ;;  %v925_v3 = vld [vmem:[#allocation11 + $0x130] sm:$0xff]  ;;  %v1604_v56 = vpack.c.bf16 %v900_v55, %v899_v54 }
  0xcf   : > { %1581 = vmatpush3.bf16.msra.mxu0 %v1580_v2  ;;  %v1622_v7 = vpack.c.bf16 %v926_v4, %v925_v3 }
  0xd0   : > { %1485 = vmatmul.mubr.f32.gmra.mrb[4].mxu1 %v2310_v58  ;;  %1583 = vmatprep.subr.bf16.mxu0 %v1582_v8 }
  0xd1   : > { %1621 = vmatpush3.bf16.msra.mxu1 %v1618_v60  ;;  %v1606_v60 = vpack.c.bf16 %v918_v59, %v917_v57 }
  0xd2   : > { %1623 = vmatprep.subr.bf16.mxu1 %v1622_v7 }
  0xd3   : > { %1585 = vmatpush3.bf16.msra.mxu0 %v1584_v11 }
  0xd4   : > { %1587 = vmatprep.subr.bf16.mxu0 %v1586_v17 }
  0xd5   : > { %1625 = vmatpush3.bf16.msra.mxu1 %v1622_v7 }
  0xd6   : > { %1627 = vmatprep.subr.bf16.mxu1 %v1626_v16 }
  0xd7   : > { %1589 = vmatpush3.bf16.msra.mxu0 %v1588_v20 }
  0xd9   : > { %1629 = vmatpush3.bf16.msra.mxu1 %v1626_v16 }
 0x199   : > { %v1362_v0 = vpop.f32.mrb[0].mxu0 }
 0x19a   : > { %v1363_v24 = vpop.f32.mrb[1].mxu0 }
 0x19b   : > { %v1364_v26 = vadd.f32 %v1363_v24, %v1362_v0  ;;  %v773_v27 = vpop.f32.mrb[0].mxu1  ;;  %v910_v0 = vld [vmem:[#allocation11 + $0xb8] sm:$0xff]  ;;  %v1630_v24 = vpack.c.bf16 %v930_v22, %v929_v21 }
 0x19c   : > { %v1480_v28 = vpop.f32.mrb[1].mxu1 }
 0x19d   : > { %v1365_v29 = vpop.f32.mrb[2].mxu0  ;;  %v694_v30 = vadd.f32 %v1364_v26, %v1316_v25  ;;  %v893_v26 = vld [vmem:[#allocation11 + $0x30] sm:$0xff]  ;;  %1631 = vmatprep.subr.bf16.mxu1 %v1630_v24 }
 0x19e   : > { %v1366_v31 = vpop.f32.mrb[3].mxu0  ;;  %1633 = vmatpush3.bf16.msra.mxu1 %v1630_v24 }
 0x19f   : > { %v2329_v32 = vadd.f32 %v773_v27, %v694_v30  ;;  %v1367_v33 = vadd.f32 %v1366_v31, %v1365_v29  ;;  %v778_v34 = vpop.f32.mrb[2].mxu1  ;;  %v894_v27 = vld [vmem:[#allocation11 + $0x38] sm:$0xff]  ;;  %v931_v29 = vld [vmem:[#allocation11 + $0x160] sm:$0xff]  ;;  %v932_v30 = vld [vmem:[#allocation11 + $0x168] sm:$0xff] }
 0x1a0   : > { %v1483_v35 = vpop.f32.mrb[3].mxu1  ;;  %v1592_v28 = vpack.c.bf16 %v894_v27, %v893_v26  ;;  %v911_v31 = vld [vmem:[#allocation11 + $0xc0] sm:$0xff]  ;;  %v1317_v27 = vld [vmem:[%s2432_s5] ss:$0 sm:$0xff] }
 0x1a1   : > { %789 = vadd.xlane.f32.xlu0 %v2329_v32  ;;  %v1368_v36 = vpop.f32.mrb[4].mxu0  ;;  %v699_v37 = vadd.f32 %v1367_v33, %v1316_v25  ;;  %v795_v38 = vmul.f32 %v2329_v32, %v2329_v32  ;;  %v912_v33 = vld [vmem:[#allocation11 + $0xc8] sm:$0xff] }
 0x1a2   : > { %v1369_v39 = vpop.f32.mrb[5].mxu0  ;;  %v1594_v35 = vpack.c.bf16 %v912_v33, %v911_v31 }
 0x1a3   : > { %v2334_v40 = vadd.f32 %v778_v34, %v699_v37  ;;  %v1370_v41 = vadd.f32 %v1369_v39, %v1368_v36  ;;  %798 = vadd.xlane.f32.xlu1 %v795_v38  ;;  %v783_v42 = vpop.f32.mrb[4].mxu1  ;;  %v1634_v34 = vpack.c.bf16 %v932_v30, %v931_v29  ;;  %v895_v36 = vld [vmem:[#allocation11 + $0x40] sm:$0xff]  ;;  %v896_v37 = vld [vmem:[#allocation11 + $0x48] sm:$0xff]  ;;  %v933_v39 = vld [vmem:[#allocation11 + $0x170] sm:$0xff] }
 0x1a4   : > { %v1486_v43 = vpop.f32.mrb[5].mxu1  ;;  %v1596_v38 = vpack.c.bf16 %v896_v37, %v895_v36  ;;  %v1318_v29 = vld [vmem:[%s2433_s6] ss:$0 sm:$0xff] }
 0x1a5   : > { %791 = vadd.xlane.f32.xlu0 %v2334_v40  ;;  %v704_v44 = vadd.f32 %v1370_v41, %v1316_v25  ;;  %v796_v45 = vmul.f32 %v2334_v40, %v2334_v40  ;;  %v1590_v25 = vpack.c.bf16 %v910_v0, %v909_v23  ;;  %1635 = vmatprep.subr.bf16.mxu1 %v1634_v34  ;;  %v934_v41 = vld [vmem:[#allocation11 + $0x178] sm:$0xff] }
 0x1a6   : > { %1637 = vmatpush3.bf16.msra.mxu1 %v1634_v34  ;;  %v914_v43 = vld [vmem:[#allocation11 + $0xd8] sm:$0xff] }
 0x1a7   : > { %v2339_v46 = vadd.f32 %v783_v42, %v704_v44  ;;  %800 = vadd.xlane.f32.xlu1 %v796_v45  ;;  %1591 = vmatprep.subr.bf16.mxu0 %v1590_v25  ;;  %v913_v42 = vld [vmem:[#allocation11 + $0xd0] sm:$0xff]  ;;  %v1638_v44 = vpack.c.bf16 %v934_v41, %v933_v39 }
 0x1a8   : > { %1593 = vmatpush3.bf16.msra.mxu0 %v1592_v28  ;;  %v1598_v45 = vpack.c.bf16 %v914_v43, %v913_v42 }
 0x1a9   : > { %793 = vadd.xlane.f32.xlu0 %v2339_v46  ;;  %v797_v47 = vmul.f32 %v2339_v46, %v2339_v46  ;;  %1595 = vmatprep.subr.bf16.mxu0 %v1594_v35 }
 0x1aa   : > { %1639 = vmatprep.subr.bf16.mxu1 %v1638_v44 }
 0x1ab   : > { %802 = vadd.xlane.f32.xlu1 %v797_v47  ;;  %v897_v47 = vld [vmem:[#allocation11 + $0x50] sm:$0xff]  ;;  %1641 = vmatpush3.bf16.msra.mxu1 %v1638_v44 }
 0x1ac   : > { %1597 = vmatpush3.bf16.msra.mxu0 %v1596_v38  ;;  %v1600_v49 = vpack.c.bf16 %v898_v48, %v897_v47 }
 0x1ad   : > { %1599 = vmatprep.subr.bf16.mxu0 %v1598_v45 }
 0x1b0   : > { %1601 = vmatpush3.bf16.msra.mxu0 %v1600_v49 }
 0x1b1   : > { %1603 = vmatprep.subr.bf16.mxu0 %v1602_v53 }
 0x1b4   : > { %1605 = vmatpush3.bf16.msra.mxu0 %v1604_v56 }
 0x1b5   : > { %1607 = vmatprep.subr.bf16.mxu0 %v1606_v60 }
 0x1b8   : > { %1609 = vmatpush3.bf16.msra.mxu0 %v1608_v63 }
 0x22e   : > { %v790_v2 = vpop.xlane.xlu0 %789 }
 0x22f   : > { %v804_v3 = vmul.f32 0.03125, %v790_v2 }
 0x230   : > { %v799_v4 = vpop.xlane.xlu1 %798 }
 0x231   : > { %v810_v5 = vmul.f32 %v804_v3, %v804_v3  ;;  %v807_v6 = vmul.f32 0.03125, %v799_v4  ;;  %v819_v25 = vsub.f32 %v2329_v32, %v804_v3 }
 0x232   : > { %v792_v7 = vpop.xlane.xlu0 %791 }
 0x233   : > { %v813_v8 = vsub.f32 %v807_v6, %v810_v5  ;;  %v805_v9 = vmul.f32 0.03125, %v792_v7 }
 0x234   : > { %v801_v10 = vpop.xlane.xlu1 %800 }
 0x235   : > { %v816_v11 = vmax.f32 %v813_v8, 0.0  ;;  %v811_v12 = vmul.f32 %v805_v9, %v805_v9  ;;  %v808_v13 = vmul.f32 0.03125, %v801_v10  ;;  %v820_v31 = vsub.f32 %v2334_v40, %v805_v9 }
 0x236   : > { %v794_v14 = vpop.xlane.xlu0 %793 }
 0x237   : > { %v822_v15 = vadd.f32 1e-08, %v816_v11  ;;  %v814_v16 = vsub.f32 %v808_v13, %v811_v12  ;;  %v806_v17 = vmul.f32 0.03125, %v794_v14 }
 0x238   : > { %v803_v18 = vpop.xlane.xlu1 %802 }
 0x239   : > { %1737 = vrsqrt.f32 %v822_v15  ;;  %v817_v19 = vmax.f32 %v814_v16, 0.0  ;;  %v812_v20 = vmul.f32 %v806_v17, %v806_v17  ;;  %v809_v21 = vmul.f32 0.03125, %v803_v18 }
 0x23a   : > { %v821_v32 = vsub.f32 %v2339_v46, %v806_v17 }
 0x23b   : > { %v823_v22 = vadd.f32 1e-08, %v817_v19  ;;  %v815_v23 = vsub.f32 %v809_v21, %v812_v20 }
 0x23d   : > { %1739 = vrsqrt.f32 %v823_v22  ;;  %v818_v0 = vmax.f32 %v815_v23, 0.0 }
 0x23f   : > { %v824_v24 = vadd.f32 1e-08, %v818_v0 }
 0x241   : > { %1741 = vrsqrt.f32 %v824_v24 }
 0x243   : > { %v1738_v26 = vpop.eup %1737 }
 0x244   : > { %v828_v28 = vmul.f32 %v1738_v26, %v819_v25 }
 0x246   : > { %v837_v30 = vmul.f32 %v1317_v27, %v828_v28  ;;  %v1320_v28 = vld [vmem:[%s2436_s9] ss:$0 sm:$0xff] }
 0x247   : > { %v1740_v33 = vpop.eup %1739 }
 0x248   : > { %v846_v34 = vadd.f32 %v1318_v29, %v837_v30  ;;  %v829_v35 = vmul.f32 %v1740_v33, %v820_v31  ;;  %v1321_v30 = vld [vmem:[%s2480_s10] ss:$0 sm:$0xff] }
 0x24a   : > { %v838_v36 = vmul.f32 %v1317_v27, %v829_v35  ;;  %v849_v38 = vmax.f32 %v846_v34, 0.0 }
 0x24b   : > { %v1742_v37 = vpop.eup %1741 }
 0x24c   : > { %v847_v39 = vadd.f32 %v1318_v29, %v838_v36  ;;  %v830_v41 = vmul.f32 %v1742_v37, %v821_v32  ;;  %v856_v44 = vrot.slane %v849_v38, 4  ;;  %v865_v45 = vrot.slane %v849_v38, 6 }
 0x24d   : > { %v1141_v32 = vstv %s1140_s7 }
 0x24e   : > { %v850_v42 = vmax.f32 %v847_v39, 0.0  ;;  %v839_v43 = vmul.f32 %v1317_v27, %v830_v41 }
 0x250   : > { %v857_v47 = vrot.slane %v850_v42, 4  ;;  %v866_v48 = vrot.slane %v850_v42, 6  ;;  %1519 = vmatprep.mubr.f32.mxu1 %v850_v42  ;;  %v848_v49 = vadd.f32 %v1318_v29, %v839_v43 }
 0x252   : > { %v858_v40 = vsel %vm855_vm3, %v856_v44, %v857_v47  ;;  %v867_v51 = vsel %vm516_vm2, %v865_v45, %v866_v48  ;;  %v851_v46 = vmax.f32 %v848_v49, 0.0 }
 0x253   : > { %863 = vst [vmem:[#allocation3] sm:$0xff] %v858_v40  ;;  %872 = vst [vmem:[#allocation3 + $0x8] sm:$0xff] %v867_v51 }
 0x254   : > { %879 = vst [vmem:[#allocation3] sm:$0xf] %v1966_v1  ;;  %880 = vst [vmem:[#allocation3 + $0x8] sm:$0x3] %v1966_v1  ;;  %v859_v52 = vrot.slane %v851_v46, 4  ;;  %v868_v53 = vrot.slane %v851_v46, 6  ;;  %1520 = vmatmul.mubr.f32.vlgmr.msra.gmra.mrb[6].mxu1 %v851_v46 }
 0x255   : > { %v1319_v1 = vld [vmem:[%s2435_s8] ss:$0 sm:$0xff] }
 0x256   : > { %v860_v54 = vsel %vm855_vm3, %v857_v47, %v859_v52  ;;  %v869_v55 = vsel %vm516_vm2, %v866_v48, %v868_v53 }
 0x25b   : > { %v882_v56 = vld [vmem:[#allocation3 + $0x8] sm:$0xff]  ;;  %v881_v57 = vld [vmem:[#allocation3] sm:$0xff] }
 0x25c   : > { %1006 = vmatprep.mubr.f32.mxu0 %v882_v56 }
 0x25d   : > { %1007 = vmatmul.mubr.f32.vlgmr.msra.gmra.mrb[6].mxu0 %v881_v57 }
 0x25e   : > { %1011 = vmatprep.mubr.f32.mxu0 %v869_v55 }
 0x261   : > { %1012 = vmatmul.mubr.f32.gmra.mrb[8].mxu0 %v860_v54 }
 0x327   : > { %v1521_v59 = vpop.f32.mrb[6].mxu1 }
 0x328   : > { %v1083_v60 = vpop.f32.mrb[7].mxu1 }
 0x330   : > { %v1422_v61 = vpop.f32.mrb[6].mxu0 }
 0x331   : > { %v1423_v62 = vpop.f32.mrb[7].mxu0 }
 0x332   : > { %v1424_v63 = vadd.f32 %v1423_v62, %v1422_v61 }
 0x334   : > { %v1009_v2 = vadd.f32 %v1424_v63, %v1319_v1  ;;  %v1425_v3 = vpop.f32.mrb[8].mxu0 }
 0x335   : > { %v1426_v4 = vpop.f32.mrb[9].mxu0 }
 0x336   : > { %v1427_v5 = vadd.f32 %v1426_v4, %v1425_v3  ;;  %v1084_v6 = vadd.f32 %v1083_v60, %v1009_v2 }
 0x338   : > { %v1014_v7 = vadd.f32 %v1427_v5, %v1319_v1  ;;  %1094 = vadd.xlane.f32.xlu0 %v1084_v6  ;;  %v1098_v8 = vmul.f32 %v1084_v6, %v1084_v6 }
 0x33a   : > { %v1089_v9 = vadd.f32 %v1521_v59, %v1014_v7 }
 0x33c   : > { %1100 = vadd.xlane.f32.xlu0 %v1098_v8  ;;  %1096 = vadd.xlane.f32.xlu1 %v1089_v9  ;;  %v1099_v10 = vmul.f32 %v1089_v9, %v1089_v9 }
 0x340   : > { %1102 = vadd.xlane.f32.xlu1 %v1099_v10 }
 0x3c5   : > { %v1095_v11 = vpop.xlane.xlu0 %1094 }
 0x3c6   : > { %v1104_v12 = vmul.f32 0.03125, %v1095_v11 }
 0x3c8   : > { %v1108_v15 = vmul.f32 %v1104_v12, %v1104_v12  ;;  %v1114_v26 = vsub.f32 %v1084_v6, %v1104_v12 }
 0x3c9   : > { %v1101_v13 = vpop.xlane.xlu0 %1100  ;;  %v1097_v14 = vpop.xlane.xlu1 %1096 }
 0x3ca   : > { %v1106_v16 = vmul.f32 0.03125, %v1101_v13  ;;  %v1105_v17 = vmul.f32 0.03125, %v1097_v14 }
 0x3cc   : > { %v1110_v18 = vsub.f32 %v1106_v16, %v1108_v15  ;;  %v1109_v21 = vmul.f32 %v1105_v17, %v1105_v17  ;;  %v1115_v33 = vsub.f32 %v1089_v9, %v1105_v17 }
 0x3cd   : > { %v1103_v19 = vpop.xlane.xlu1 %1102 }
 0x3ce   : > { %v1112_v20 = vmax.f32 %v1110_v18, 0.0  ;;  %v1107_v22 = vmul.f32 0.03125, %v1103_v19 }
 0x3d0   : > { %v1116_v23 = vadd.f32 1e-08, %v1112_v20  ;;  %v1111_v0 = vsub.f32 %v1107_v22, %v1109_v21 }
 0x3d2   : > { %1743 = vrsqrt.f32 %v1116_v23  ;;  %v1113_v24 = vmax.f32 %v1111_v0, 0.0 }
 0x3d4   : > { %v1117_v25 = vadd.f32 1e-08, %v1113_v24 }
 0x3d6   : > { %1745 = vrsqrt.f32 %v1117_v25 }
 0x3dc   : > { %v1744_v27 = vpop.eup %1743 }
 0x3dd   : > { %v1120_v29 = vmul.f32 %v1744_v27, %v1114_v26 }
 0x3df   : > { %v1128_v31 = vmul.f32 %v1320_v28, %v1120_v29 }
 0x3e0   : > { %v1746_v34 = vpop.eup %1745 }
 0x3e1   : > { %v1136_v35 = vadd.f32 %v1321_v30, %v1128_v31  ;;  %v1121_v36 = vmul.f32 %v1746_v34, %v1115_v33 }
 0x3e3   : > { %v1138_v37 = vmax.f32 %v1136_v35, 0.0  ;;  %v1129_v38 = vmul.f32 %v1320_v28, %v1121_v36 }
 0x3e5   : > { %v1142_v39 = vmul.f32 %v1141_v32, %v1138_v37  ;;  %v1137_v41 = vadd.f32 %v1321_v30, %v1129_v38 }
 0x3e7   : > { %v1139_v42 = vmax.f32 %v1137_v41, 0.0  ;;  %v1146_v43 = vadd.f32 %v1142_v39, %v2303_v50 }
 0x3e9   : > { %v1143_v44 = vmul.f32 %v1141_v32, %v1139_v42  ;;  %1148 = vst [vmem:[%s505_s25] sm:$0xff] %v1146_v43 }
 0x3eb   : > { %v1147_v45 = vadd.f32 %v1143_v44, %v2310_v58 }
 0x3ed   : > { %1149 = vst [vmem:[%s505_s25 + $0x8] sm:$0xff] %v1147_v45 }
 0x3ee   : > { %1876 = shalt.err (!%p1873_p7)
}
 0x3ef   : > { %s1877_s12 = scalar_lea.hbm %s2375_s26, 256  ;;  %s1881_s7 = scalar_lea.hbm %s2481_s0, 512 }
 0x3f0   : > { %p1878_p12 = scmp.ne.s32.totalorder %s2375_s26, %s1877_s12  ;;  %p1882_p11 = scmp.lt.u32.totalorder %s2375_s26, %s2481_s0 }
 0x3f1   : > { %p1883_p13 = scmp.lt.u32.totalorder %s1881_s7, %s1877_s12  ;;  %p1885_p2 = scmp.lt.u32.totalorder %s1877_s12, %s2375_s26 }
 0x3f2   : > { %p1879_p1 = pnand %p1878_p12, %p2482_p6 }
 0x3f3   : > { %p1884_p0 = por %p1883_p13, %p1882_p11 }
 0x3f4   : > { %p1880_p8 = pneg %p1879_p1 }
 0x3f5   : > { %p1886_p10 = por %p1885_p2, %p1884_p0 }
 0x3f7   : > { %p1887_p3 = pnand %p1886_p10, %p1880_p8 }
 0x3f9   : > { %1890 = shalt.err (!%p1887_p3)
}
 0x3fa   : > { %s1969_s27 = smov 128   ;;  %s1970_s14 = smov 8  }
 0x3fb   : > { %1654 = dma.vmem_to_hbm [thread:$0]  (%p2482_p6), %s2377_s17, 256, %s2375_s26, %s1151_s3, %s1969_s27, %s1969_s27, %s1970_s14  }
 0x3fc PF: > { %s2483_s10 = sld [smem:[#allocation19_spill]]  ;;  %s2484_s1 = sld [smem:[#allocation22_spill]] }
 0x3fd   : > { %p2486_p9 = scmp.ge.s32.totalorder %s1957_s24, 2 }
 0x402   : > { %s1181_s25 = sand.u32 1, %s2483_s10   ;;  %p2485_p4 = scmp.ne.s32.totalorder %s2484_s1, 0 }
 0x403   : > { %s1182_s28 = scalar_lea.sflag [#allocation7], %s1181_s25 }
 0x404   : > { %p1671_p5 = pnand %p2486_p9, %p2485_p4 }
 0x406   : > { %1932 = dma.done.wait (!%p1671_p5), %s1182_s28, 256  }
 0x407   : > { %1934 = vsyncadd (!%p1671_p5), %s1182_s28, 4294967040  ;;  %s32_s24 = sadd.s32 1, %s1957_s24   ;;  %s2487_s13 = sld [smem:[#allocation20_spill]] }
 0x408   : > { %p29_p7 = scmp.ge.s32.totalorder %s32_s24, 4   ;;  %s2488_s21 = sld [smem:[#allocation24_spill]] }
 0x409   : > { %s2489_s22 = sld [smem:[#allocation21_spill]]  ;;  %s2490_s23 = sld [smem:[#allocation23_spill]] }
 0x40a   : > { %s2491_s19 = smov %s1941_s20  ;;  %31 = sbr.rel (!%p29_p7) target bundleno = 16 (0x10), region = 142 }
 0x40d   : > { %s2492_s20 = smov %s2487_s13 }
 0x411   :  { %1187 = vsyncpa [#allocation6], 1 }
 0x412   :  { %1189 = vsyncpa [#allocation6 + $0x1], 1 }
 0x413   :  { %1190 = vsyncpa [#allocation9], 1 }
 0x414   :  { %1192 = vsyncpa [#allocation9 + $0x1], 1 }
 0x415   :  { %1193 = vsyncpa [#allocation12], 1 }
 0x416   :  { %1194 = vsyncpa [#allocation7], 1 }
 0x417   :  { %1196 = vsyncpa [#allocation7 + $0x1], 1 }

</bundles_post_ra>
